<compile_context>
chip_gen: v6e
topology: v6e:2x2x1
jax: 0.10.0
libtpu: 0.0.40
codegen_flags: <defaults>
</compile_context>

<pallas_src>
import functools

import jax
import jax.numpy as jnp
import numpy as np
from jax.experimental import pallas as pl
from jax.experimental.pallas import tpu as pltpu


# -----------------------------------------------------------------------------
# Fused kernel: all layers for one batch element.
# -----------------------------------------------------------------------------
def _encoder_kernel(num_layers, k, x_ref, *refs):
    o_ref = refs[-1]
    layer_refs = refs[:-1]

    x = x_ref[0]                                   # (H, W*Cin) activation of layer 1
    for l in range(num_layers):
        r_ref = layer_refs[3 * l]                  # (k, OH, H)           one-hot row taps
        m_ref = layer_refs[3 * l + 1]              # (k, W*Cin, OW*Cout)  tap weights (BN-scaled)
        s_ref = layer_refs[3 * l + 2]              # (1, OW*Cout)         folded bias+BN shift

        acc = None
        for di in range(k):
            sel = jnp.dot(r_ref[di], x, preferred_element_type=jnp.float32)       # (OH, W*Cin)
            part = jnp.dot(sel, m_ref[di], preferred_element_type=jnp.float32)    # (OH, OW*Cout)
            acc = part if acc is None else acc + part

        y = acc + s_ref[...]                       # conv bias + BN affine (folded)
        x = jnp.where(y >= 0.0, y, 0.01 * y)       # LeakyReLU(0.01)

    o_ref[0] = x                                   # (OH_last, OW_last*Cout_last)


# -----------------------------------------------------------------------------
# Wrapper-side constant construction (tiny, done once per layer).
# -----------------------------------------------------------------------------
def _build_layer_consts(w_oihw, bias, gamma, beta, rmean, rvar,
                        H, W, k, stride, eps=1e-5):
    Cout, Cin, _, _ = w_oihw.shape
    OH = (H - k) // stride + 1
    OW = (W - k) // stride + 1

    scale = gamma / jnp.sqrt(rvar + eps)                          # (Cout,)

    # Row-tap selectors: R[di, oh, h] = 1 iff h == stride*oh + di
    oh_idx = jnp.arange(OH)[:, None]
    h_idx = jnp.arange(H)[None, :]
    R = jnp.stack(
        [(h_idx == (stride * oh_idx + di)).astype(jnp.float32) for di in range(k)],
        axis=0)                                                   # (k, OH, H)

    # Column-tap weights with BN scale folded in:
    # M[di, w*Cin+cin, ow*Cout+cout] = scale[cout] * w[cout,cin,di,w-stride*ow]
    #                                  if 0 <= w-stride*ow < k else 0
    w_scaled = w_oihw.astype(jnp.float32) * scale[:, None, None, None]  # (Cout,Cin,k,k)
    w_idx = jnp.arange(W)[:, None]
    ow_idx = jnp.arange(OW)[None, :]
    dj = w_idx - stride * ow_idx                                  # (W, OW)
    valid = (dj >= 0) & (dj < k)
    djc = jnp.clip(dj, 0, k - 1)
    Ms = []
    for di in range(k):
        w_di = w_scaled[:, :, di, :]                              # (Cout, Cin, k)
        g = w_di[:, :, djc]                                       # (Cout, Cin, W, OW)
        g = jnp.where(valid[None, None, :, :], g, 0.0)
        g = jnp.transpose(g, (2, 1, 3, 0)).reshape(W * Cin, OW * Cout)
        Ms.append(g)
    M = jnp.stack(Ms, axis=0)                                     # (k, W*Cin, OW*Cout)

    # Conv bias + BN shift folded, tiled along OW so it broadcasts over rows.
    shift = scale * bias + beta - rmean * scale                   # (Cout,)
    s = jnp.tile(shift, OW).reshape(1, OW * Cout).astype(jnp.float32)
    return R, M, s, OH, OW


# -----------------------------------------------------------------------------
# Forward pass: one fused pallas_call.
# -----------------------------------------------------------------------------
def encoder_forward(x_nchw, params, k, stride=2):
    """x_nchw: (B, Cin, H, W) like PyTorch. Returns (B, flattened_features)."""
    B, C0, H, W = x_nchw.shape

    # NCHW -> (B, H, W*Cin)  : spatial-major rows, (w, cin) packed into lanes.
    x2d = jnp.transpose(x_nchw, (0, 2, 3, 1)).reshape(B, H, W * C0).astype(jnp.float32)

    in_specs = [pl.BlockSpec((1, H, W * C0), lambda b: (b, 0, 0))]
    flat_args = [x2d]

    h, w, cin = H, W, C0
    for p in params:
        R, M, s, OH, OW = _build_layer_consts(
            p["w"], p["b"], p["gamma"], p["beta"], p["rmean"], p["rvar"],
            h, w, k, stride)
        cout = p["w"].shape[0]
        in_specs += [
            pl.BlockSpec(R.shape, lambda b: (0, 0, 0)),
            pl.BlockSpec(M.shape, lambda b: (0, 0, 0)),
            pl.BlockSpec(s.shape, lambda b: (0, 0)),
        ]
        flat_args += [R, M, s]
        h, w, cin = OH, OW, cout

    OHf, OWf, Cf = h, w, cin
    kernel = functools.partial(_encoder_kernel, len(params), k)

    out = pl.pallas_call(
        kernel,
        out_shape=jax.ShapeDtypeStruct((B, OHf, OWf * Cf), jnp.float32),
        grid_spec=pltpu.PrefetchScalarGridSpec(
            num_scalar_prefetch=0,
            grid=(B,),
            in_specs=in_specs,
            out_specs=pl.BlockSpec((1, OHf, OWf * Cf), lambda b: (b, 0, 0)),
        ),
        compiler_params=pltpu.CompilerParams(
            dimension_semantics=("parallel",)),
    )(*flat_args)

    # (B, OH, OW*Cout) -> PyTorch NCHW .view(B, -1) ordering (channel-major).
    out = out.reshape(B, OHf, OWf, Cf)
    out = jnp.transpose(out, (0, 3, 1, 2)).reshape(B, -1)
    return out


# -----------------------------------------------------------------------------
# Parameter construction (deterministic, mirrors the PyTorch __init__).
# -----------------------------------------------------------------------------
def xavier_uniform_conv(key, cout, cin, k):
    fan_in = cin * k * k
    fan_out = cout * k * k
    limit = (6.0 / (fan_in + fan_out)) ** 0.5
    return jax.random.uniform(key, (cout, cin, k, k), jnp.float32, -limit, limit)


def conv_bias(key, cout, cin, k):
    bound = 1.0 / (cin * k * k) ** 0.5
    return jax.random.uniform(key, (cout,), jnp.float32, -bound, bound)


def make_encoder_params(key, conv_layers, k, input_channels):
    chans = [(input_channels, conv_layers),
             (conv_layers, conv_layers),
             (conv_layers, conv_layers * 2),
             (conv_layers * 2, conv_layers * 2)]
    params = []
    for cin, cout in chans:
        key, kw, kb = jax.random.split(key, 3)
        params.append(dict(
            w=xavier_uniform_conv(kw, cout, cin, k),
            b=conv_bias(kb, cout, cin, k),
            # BatchNorm2d default init / running stats (eval-mode semantics).
            gamma=jnp.ones((cout,), jnp.float32),
            beta=jnp.zeros((cout,), jnp.float32),
            rmean=jnp.zeros((cout,), jnp.float32),
            rvar=jnp.ones((cout,), jnp.float32),
        ))
    return params


# -----------------------------------------------------------------------------
# Pure-JAX reference (for a loose numerical sanity check).
# -----------------------------------------------------------------------------
def encoder_reference(x_nchw, params, stride=2, eps=1e-5):
    x = x_nchw
    for p in params:
        y = jax.lax.conv_general_dilated(
            x, p["w"], window_strides=(stride, stride), padding="VALID",
            dimension_numbers=("NCHW", "OIHW", "NCHW"))
        y = y + p["b"][None, :, None, None]
        scale = p["gamma"] / jnp.sqrt(p["rvar"] + eps)
        shift = p["beta"] - p["rmean"] * scale
        y = y * scale[None, :, None, None] + shift[None, :, None, None]
        x = jnp.where(y >= 0.0, y, 0.01 * y)
    return x.reshape(x.shape[0], -1)


if __name__ == "__main__":
    conv_layers = 8
    conv_kernel_size = 3
    input_channels = 4
    height = width = 32   # 32 -> 15 -> 7 -> 3 -> 1 with k=3, stride=2
    batch = 2

    key = jax.random.PRNGKey(0)
    key, kx = jax.random.split(key)
    x = jax.random.normal(kx, (batch, input_channels, height, width), jnp.float32)

    params = make_encoder_params(key, conv_layers, conv_kernel_size, input_channels)

    out = encoder_forward(x, params, conv_kernel_size)
    out = jax.block_until_ready(out)
    assert out.shape == (batch, conv_layers * 2 * 1 * 1), out.shape

    ref = jax.block_until_ready(encoder_reference(x, params))
    assert np.allclose(np.asarray(out), np.asarray(ref), rtol=5e-2, atol=5e-2), (
        "max abs diff = %g" % float(np.max(np.abs(np.asarray(out) - np.asarray(ref)))))

    print("KERNEL_OK")
</pallas_src>

<mosaic_0001>
module attributes {stable_mosaic.version = 11 : i64} {
  func.func @_encoder_kernel(%arg0: i32, %arg1: memref<1x32x128xf32, #tpu.memory_space<vmem>>, %arg2: memref<3x15x32xf32, #tpu.memory_space<vmem>>, %arg3: memref<3x128x120xf32, #tpu.memory_space<vmem>>, %arg4: memref<1x120xf32, #tpu.memory_space<vmem>>, %arg5: memref<3x7x15xf32, #tpu.memory_space<vmem>>, %arg6: memref<3x120x56xf32, #tpu.memory_space<vmem>>, %arg7: memref<1x56xf32, #tpu.memory_space<vmem>>, %arg8: memref<3x3x7xf32, #tpu.memory_space<vmem>>, %arg9: memref<3x56x48xf32, #tpu.memory_space<vmem>>, %arg10: memref<1x48xf32, #tpu.memory_space<vmem>>, %arg11: memref<3x1x3xf32, #tpu.memory_space<vmem>>, %arg12: memref<3x48x16xf32, #tpu.memory_space<vmem>>, %arg13: memref<1x16xf32, #tpu.memory_space<vmem>>, %arg14: memref<1x1x16xf32, #tpu.memory_space<vmem>>) attributes {dimension_semantics = [#tpu.dimension_semantics<parallel>], iteration_bounds = array<i64: 2>, scalar_prefetch = 0 : i64, scratch_operands = 0 : i64, tpu.core_type = #tpu.core_type<tc>, window_params = [{transform_indices = @transform_0, window_bounds = array<i64: 1, 32, 128>}, {pipeline_mode = #tpu.pipeline_mode<synchronous>, transform_indices = @transform_1, window_bounds = array<i64: 3, 15, 32>}, {pipeline_mode = #tpu.pipeline_mode<synchronous>, transform_indices = @transform_2, window_bounds = array<i64: 3, 128, 120>}, {pipeline_mode = #tpu.pipeline_mode<synchronous>, transform_indices = @transform_3, window_bounds = array<i64: 1, 120>}, {pipeline_mode = #tpu.pipeline_mode<synchronous>, transform_indices = @transform_4, window_bounds = array<i64: 3, 7, 15>}, {pipeline_mode = #tpu.pipeline_mode<synchronous>, transform_indices = @transform_5, window_bounds = array<i64: 3, 120, 56>}, {pipeline_mode = #tpu.pipeline_mode<synchronous>, transform_indices = @transform_6, window_bounds = array<i64: 1, 56>}, {pipeline_mode = #tpu.pipeline_mode<synchronous>, transform_indices = @transform_7, window_bounds = array<i64: 3, 3, 7>}, {pipeline_mode = #tpu.pipeline_mode<synchronous>, transform_indices = @transform_8, window_bounds = array<i64: 3, 56, 48>}, {pipeline_mode = #tpu.pipeline_mode<synchronous>, transform_indices = @transform_9, window_bounds = array<i64: 1, 48>}, {pipeline_mode = #tpu.pipeline_mode<synchronous>, transform_indices = @transform_10, window_bounds = array<i64: 3, 1, 3>}, {pipeline_mode = #tpu.pipeline_mode<synchronous>, transform_indices = @transform_11, window_bounds = array<i64: 3, 48, 16>}, {pipeline_mode = #tpu.pipeline_mode<synchronous>, transform_indices = @transform_12, window_bounds = array<i64: 1, 16>}, {transform_indices = @transform_13, window_bounds = array<i64: 1, 1, 16>}]} {
    %c0 = arith.constant 0 : index
    %c0_0 = arith.constant 0 : index
    %c0_1 = arith.constant 0 : index
    %0 = vector.load %arg1[%c0, %c0_0, %c0_1] : memref<1x32x128xf32, #tpu.memory_space<vmem>>, vector<1x32x128xf32>
    %1 = vector.shape_cast %0 : vector<1x32x128xf32> to vector<32x128xf32>
    %c0_2 = arith.constant 0 : index
    %c0_3 = arith.constant 0 : index
    %c0_4 = arith.constant 0 : index
    %2 = vector.load %arg2[%c0_2, %c0_3, %c0_4] : memref<3x15x32xf32, #tpu.memory_space<vmem>>, vector<1x15x32xf32>
    %3 = vector.shape_cast %2 : vector<1x15x32xf32> to vector<15x32xf32>
    %cst = arith.constant dense<0.000000e+00> : vector<15x128xf32>
    %4 = tpu.matmul %3, %1, %cst {dimension_numbers = #tpu.dot_dimension_numbers<[1], [0], [0], [1], [0, 0, 1, 1], [], []>} : vector<15x32xf32>, vector<32x128xf32>, vector<15x128xf32> -> vector<15x128xf32>
    %c0_5 = arith.constant 0 : index
    %c0_6 = arith.constant 0 : index
    %c0_7 = arith.constant 0 : index
    %5 = vector.load %arg3[%c0_5, %c0_6, %c0_7] : memref<3x128x120xf32, #tpu.memory_space<vmem>>, vector<1x128x120xf32>
    %6 = vector.shape_cast %5 : vector<1x128x120xf32> to vector<128x120xf32>
    %cst_8 = arith.constant dense<0.000000e+00> : vector<15x120xf32>
    %7 = tpu.matmul %4, %6, %cst_8 {dimension_numbers = #tpu.dot_dimension_numbers<[1], [0], [0], [1], [0, 0, 1, 1], [], []>} : vector<15x128xf32>, vector<128x120xf32>, vector<15x120xf32> -> vector<15x120xf32>
    %c1 = arith.constant 1 : index
    %c0_9 = arith.constant 0 : index
    %c0_10 = arith.constant 0 : index
    %8 = vector.load %arg2[%c1, %c0_9, %c0_10] : memref<3x15x32xf32, #tpu.memory_space<vmem>>, vector<1x15x32xf32>
    %9 = vector.shape_cast %8 : vector<1x15x32xf32> to vector<15x32xf32>
    %cst_11 = arith.constant dense<0.000000e+00> : vector<15x128xf32>
    %10 = tpu.matmul %9, %1, %cst_11 {dimension_numbers = #tpu.dot_dimension_numbers<[1], [0], [0], [1], [0, 0, 1, 1], [], []>} : vector<15x32xf32>, vector<32x128xf32>, vector<15x128xf32> -> vector<15x128xf32>
    %c1_12 = arith.constant 1 : index
    %c0_13 = arith.constant 0 : index
    %c0_14 = arith.constant 0 : index
    %11 = vector.load %arg3[%c1_12, %c0_13, %c0_14] : memref<3x128x120xf32, #tpu.memory_space<vmem>>, vector<1x128x120xf32>
    %12 = vector.shape_cast %11 : vector<1x128x120xf32> to vector<128x120xf32>
    %cst_15 = arith.constant dense<0.000000e+00> : vector<15x120xf32>
    %13 = tpu.matmul %10, %12, %cst_15 {dimension_numbers = #tpu.dot_dimension_numbers<[1], [0], [0], [1], [0, 0, 1, 1], [], []>} : vector<15x128xf32>, vector<128x120xf32>, vector<15x120xf32> -> vector<15x120xf32>
    %14 = arith.addf %7, %13 : vector<15x120xf32>
    %c2 = arith.constant 2 : index
    %c0_16 = arith.constant 0 : index
    %c0_17 = arith.constant 0 : index
    %15 = vector.load %arg2[%c2, %c0_16, %c0_17] : memref<3x15x32xf32, #tpu.memory_space<vmem>>, vector<1x15x32xf32>
    %16 = vector.shape_cast %15 : vector<1x15x32xf32> to vector<15x32xf32>
    %cst_18 = arith.constant dense<0.000000e+00> : vector<15x128xf32>
    %17 = tpu.matmul %16, %1, %cst_18 {dimension_numbers = #tpu.dot_dimension_numbers<[1], [0], [0], [1], [0, 0, 1, 1], [], []>} : vector<15x32xf32>, vector<32x128xf32>, vector<15x128xf32> -> vector<15x128xf32>
    %c2_19 = arith.constant 2 : index
    %c0_20 = arith.constant 0 : index
    %c0_21 = arith.constant 0 : index
    %18 = vector.load %arg3[%c2_19, %c0_20, %c0_21] : memref<3x128x120xf32, #tpu.memory_space<vmem>>, vector<1x128x120xf32>
    %19 = vector.shape_cast %18 : vector<1x128x120xf32> to vector<128x120xf32>
    %cst_22 = arith.constant dense<0.000000e+00> : vector<15x120xf32>
    %20 = tpu.matmul %17, %19, %cst_22 {dimension_numbers = #tpu.dot_dimension_numbers<[1], [0], [0], [1], [0, 0, 1, 1], [], []>} : vector<15x128xf32>, vector<128x120xf32>, vector<15x120xf32> -> vector<15x120xf32>
    %21 = arith.addf %14, %20 : vector<15x120xf32>
    %c0_23 = arith.constant 0 : index
    %c0_24 = arith.constant 0 : index
    %22 = vector.load %arg4[%c0_23, %c0_24] : memref<1x120xf32, #tpu.memory_space<vmem>>, vector<1x120xf32>
    %23 = vector.broadcast %22 : vector<1x120xf32> to vector<15x120xf32>
    %24 = arith.addf %21, %23 : vector<15x120xf32>
    %cst_25 = arith.constant 0.000000e+00 : f32
    %25 = vector.broadcast %cst_25 : f32 to vector<15x120xf32>
    %26 = arith.cmpf oge, %24, %25 : vector<15x120xf32>
    %cst_26 = arith.constant 0.00999999977 : f32
    %27 = vector.broadcast %cst_26 : f32 to vector<15x120xf32>
    %28 = arith.mulf %27, %24 : vector<15x120xf32>
    %29 = arith.select %26, %24, %28 : vector<15x120xi1>, vector<15x120xf32>
    %c0_27 = arith.constant 0 : index
    %c0_28 = arith.constant 0 : index
    %c0_29 = arith.constant 0 : index
    %30 = vector.load %arg5[%c0_27, %c0_28, %c0_29] : memref<3x7x15xf32, #tpu.memory_space<vmem>>, vector<1x7x15xf32>
    %31 = vector.shape_cast %30 : vector<1x7x15xf32> to vector<7x15xf32>
    %cst_30 = arith.constant dense<0.000000e+00> : vector<7x120xf32>
    %32 = tpu.matmul %31, %29, %cst_30 {dimension_numbers = #tpu.dot_dimension_numbers<[1], [0], [0], [1], [0, 0, 1, 1], [], []>} : vector<7x15xf32>, vector<15x120xf32>, vector<7x120xf32> -> vector<7x120xf32>
    %c0_31 = arith.constant 0 : index
    %c0_32 = arith.constant 0 : index
    %c0_33 = arith.constant 0 : index
    %33 = vector.load %arg6[%c0_31, %c0_32, %c0_33] : memref<3x120x56xf32, #tpu.memory_space<vmem>>, vector<1x120x56xf32>
    %34 = vector.shape_cast %33 : vector<1x120x56xf32> to vector<120x56xf32>
    %cst_34 = arith.constant dense<0.000000e+00> : vector<7x56xf32>
    %35 = tpu.matmul %32, %34, %cst_34 {dimension_numbers = #tpu.dot_dimension_numbers<[1], [0], [0], [1], [0, 0, 1, 1], [], []>} : vector<7x120xf32>, vector<120x56xf32>, vector<7x56xf32> -> vector<7x56xf32>
    %c1_35 = arith.constant 1 : index
    %c0_36 = arith.constant 0 : index
    %c0_37 = arith.constant 0 : index
    %36 = vector.load %arg5[%c1_35, %c0_36, %c0_37] : memref<3x7x15xf32, #tpu.memory_space<vmem>>, vector<1x7x15xf32>
    %37 = vector.shape_cast %36 : vector<1x7x15xf32> to vector<7x15xf32>
    %cst_38 = arith.constant dense<0.000000e+00> : vector<7x120xf32>
    %38 = tpu.matmul %37, %29, %cst_38 {dimension_numbers = #tpu.dot_dimension_numbers<[1], [0], [0], [1], [0, 0, 1, 1], [], []>} : vector<7x15xf32>, vector<15x120xf32>, vector<7x120xf32> -> vector<7x120xf32>
    %c1_39 = arith.constant 1 : index
    %c0_40 = arith.constant 0 : index
    %c0_41 = arith.constant 0 : index
    %39 = vector.load %arg6[%c1_39, %c0_40, %c0_41] : memref<3x120x56xf32, #tpu.memory_space<vmem>>, vector<1x120x56xf32>
    %40 = vector.shape_cast %39 : vector<1x120x56xf32> to vector<120x56xf32>
    %cst_42 = arith.constant dense<0.000000e+00> : vector<7x56xf32>
    %41 = tpu.matmul %38, %40, %cst_42 {dimension_numbers = #tpu.dot_dimension_numbers<[1], [0], [0], [1], [0, 0, 1, 1], [], []>} : vector<7x120xf32>, vector<120x56xf32>, vector<7x56xf32> -> vector<7x56xf32>
    %42 = arith.addf %35, %41 : vector<7x56xf32>
    %c2_43 = arith.constant 2 : index
    %c0_44 = arith.constant 0 : index
    %c0_45 = arith.constant 0 : index
    %43 = vector.load %arg5[%c2_43, %c0_44, %c0_45] : memref<3x7x15xf32, #tpu.memory_space<vmem>>, vector<1x7x15xf32>
    %44 = vector.shape_cast %43 : vector<1x7x15xf32> to vector<7x15xf32>
    %cst_46 = arith.constant dense<0.000000e+00> : vector<7x120xf32>
    %45 = tpu.matmul %44, %29, %cst_46 {dimension_numbers = #tpu.dot_dimension_numbers<[1], [0], [0], [1], [0, 0, 1, 1], [], []>} : vector<7x15xf32>, vector<15x120xf32>, vector<7x120xf32> -> vector<7x120xf32>
    %c2_47 = arith.constant 2 : index
    %c0_48 = arith.constant 0 : index
    %c0_49 = arith.constant 0 : index
    %46 = vector.load %arg6[%c2_47, %c0_48, %c0_49] : memref<3x120x56xf32, #tpu.memory_space<vmem>>, vector<1x120x56xf32>
    %47 = vector.shape_cast %46 : vector<1x120x56xf32> to vector<120x56xf32>
    %cst_50 = arith.constant dense<0.000000e+00> : vector<7x56xf32>
    %48 = tpu.matmul %45, %47, %cst_50 {dimension_numbers = #tpu.dot_dimension_numbers<[1], [0], [0], [1], [0, 0, 1, 1], [], []>} : vector<7x120xf32>, vector<120x56xf32>, vector<7x56xf32> -> vector<7x56xf32>
    %49 = arith.addf %42, %48 : vector<7x56xf32>
    %c0_51 = arith.constant 0 : index
    %c0_52 = arith.constant 0 : index
    %50 = vector.load %arg7[%c0_51, %c0_52] : memref<1x56xf32, #tpu.memory_space<vmem>>, vector<1x56xf32>
    %51 = vector.broadcast %50 : vector<1x56xf32> to vector<7x56xf32>
    %52 = arith.addf %49, %51 : vector<7x56xf32>
    %cst_53 = arith.constant 0.000000e+00 : f32
    %53 = vector.broadcast %cst_53 : f32 to vector<7x56xf32>
    %54 = arith.cmpf oge, %52, %53 : vector<7x56xf32>
    %cst_54 = arith.constant 0.00999999977 : f32
    %55 = vector.broadcast %cst_54 : f32 to vector<7x56xf32>
    %56 = arith.mulf %55, %52 : vector<7x56xf32>
    %57 = arith.select %54, %52, %56 : vector<7x56xi1>, vector<7x56xf32>
    %c0_55 = arith.constant 0 : index
    %c0_56 = arith.constant 0 : index
    %c0_57 = arith.constant 0 : index
    %58 = vector.load %arg8[%c0_55, %c0_56, %c0_57] : memref<3x3x7xf32, #tpu.memory_space<vmem>>, vector<1x3x7xf32>
    %59 = vector.shape_cast %58 : vector<1x3x7xf32> to vector<3x7xf32>
    %cst_58 = arith.constant dense<0.000000e+00> : vector<3x56xf32>
    %60 = tpu.matmul %59, %57, %cst_58 {dimension_numbers = #tpu.dot_dimension_numbers<[1], [0], [0], [1], [0, 0, 1, 1], [], []>} : vector<3x7xf32>, vector<7x56xf32>, vector<3x56xf32> -> vector<3x56xf32>
    %c0_59 = arith.constant 0 : index
    %c0_60 = arith.constant 0 : index
    %c0_61 = arith.constant 0 : index
    %61 = vector.load %arg9[%c0_59, %c0_60, %c0_61] : memref<3x56x48xf32, #tpu.memory_space<vmem>>, vector<1x56x48xf32>
    %62 = vector.shape_cast %61 : vector<1x56x48xf32> to vector<56x48xf32>
    %cst_62 = arith.constant dense<0.000000e+00> : vector<3x48xf32>
    %63 = tpu.matmul %60, %62, %cst_62 {dimension_numbers = #tpu.dot_dimension_numbers<[1], [0], [0], [1], [0, 0, 1, 1], [], []>} : vector<3x56xf32>, vector<56x48xf32>, vector<3x48xf32> -> vector<3x48xf32>
    %c1_63 = arith.constant 1 : index
    %c0_64 = arith.constant 0 : index
    %c0_65 = arith.constant 0 : index
    %64 = vector.load %arg8[%c1_63, %c0_64, %c0_65] : memref<3x3x7xf32, #tpu.memory_space<vmem>>, vector<1x3x7xf32>
    %65 = vector.shape_cast %64 : vector<1x3x7xf32> to vector<3x7xf32>
    %cst_66 = arith.constant dense<0.000000e+00> : vector<3x56xf32>
    %66 = tpu.matmul %65, %57, %cst_66 {dimension_numbers = #tpu.dot_dimension_numbers<[1], [0], [0], [1], [0, 0, 1, 1], [], []>} : vector<3x7xf32>, vector<7x56xf32>, vector<3x56xf32> -> vector<3x56xf32>
    %c1_67 = arith.constant 1 : index
    %c0_68 = arith.constant 0 : index
    %c0_69 = arith.constant 0 : index
    %67 = vector.load %arg9[%c1_67, %c0_68, %c0_69] : memref<3x56x48xf32, #tpu.memory_space<vmem>>, vector<1x56x48xf32>
    %68 = vector.shape_cast %67 : vector<1x56x48xf32> to vector<56x48xf32>
    %cst_70 = arith.constant dense<0.000000e+00> : vector<3x48xf32>
    %69 = tpu.matmul %66, %68, %cst_70 {dimension_numbers = #tpu.dot_dimension_numbers<[1], [0], [0], [1], [0, 0, 1, 1], [], []>} : vector<3x56xf32>, vector<56x48xf32>, vector<3x48xf32> -> vector<3x48xf32>
    %70 = arith.addf %63, %69 : vector<3x48xf32>
    %c2_71 = arith.constant 2 : index
    %c0_72 = arith.constant 0 : index
    %c0_73 = arith.constant 0 : index
    %71 = vector.load %arg8[%c2_71, %c0_72, %c0_73] : memref<3x3x7xf32, #tpu.memory_space<vmem>>, vector<1x3x7xf32>
    %72 = vector.shape_cast %71 : vector<1x3x7xf32> to vector<3x7xf32>
    %cst_74 = arith.constant dense<0.000000e+00> : vector<3x56xf32>
    %73 = tpu.matmul %72, %57, %cst_74 {dimension_numbers = #tpu.dot_dimension_numbers<[1], [0], [0], [1], [0, 0, 1, 1], [], []>} : vector<3x7xf32>, vector<7x56xf32>, vector<3x56xf32> -> vector<3x56xf32>
    %c2_75 = arith.constant 2 : index
    %c0_76 = arith.constant 0 : index
    %c0_77 = arith.constant 0 : index
    %74 = vector.load %arg9[%c2_75, %c0_76, %c0_77] : memref<3x56x48xf32, #tpu.memory_space<vmem>>, vector<1x56x48xf32>
    %75 = vector.shape_cast %74 : vector<1x56x48xf32> to vector<56x48xf32>
    %cst_78 = arith.constant dense<0.000000e+00> : vector<3x48xf32>
    %76 = tpu.matmul %73, %75, %cst_78 {dimension_numbers = #tpu.dot_dimension_numbers<[1], [0], [0], [1], [0, 0, 1, 1], [], []>} : vector<3x56xf32>, vector<56x48xf32>, vector<3x48xf32> -> vector<3x48xf32>
    %77 = arith.addf %70, %76 : vector<3x48xf32>
    %c0_79 = arith.constant 0 : index
    %c0_80 = arith.constant 0 : index
    %78 = vector.load %arg10[%c0_79, %c0_80] : memref<1x48xf32, #tpu.memory_space<vmem>>, vector<1x48xf32>
    %79 = vector.broadcast %78 : vector<1x48xf32> to vector<3x48xf32>
    %80 = arith.addf %77, %79 : vector<3x48xf32>
    %cst_81 = arith.constant 0.000000e+00 : f32
    %81 = vector.broadcast %cst_81 : f32 to vector<3x48xf32>
    %82 = arith.cmpf oge, %80, %81 : vector<3x48xf32>
    %cst_82 = arith.constant 0.00999999977 : f32
    %83 = vector.broadcast %cst_82 : f32 to vector<3x48xf32>
    %84 = arith.mulf %83, %80 : vector<3x48xf32>
    %85 = arith.select %82, %80, %84 : vector<3x48xi1>, vector<3x48xf32>
    %c0_83 = arith.constant 0 : index
    %c0_84 = arith.constant 0 : index
    %c0_85 = arith.constant 0 : index
    %86 = vector.load %arg11[%c0_83, %c0_84, %c0_85] : memref<3x1x3xf32, #tpu.memory_space<vmem>>, vector<1x1x3xf32>
    %87 = vector.shape_cast %86 : vector<1x1x3xf32> to vector<1x3xf32>
    %cst_86 = arith.constant dense<0.000000e+00> : vector<1x48xf32>
    %88 = tpu.matmul %87, %85, %cst_86 {dimension_numbers = #tpu.dot_dimension_numbers<[1], [0], [0], [1], [0, 0, 1, 1], [], []>} : vector<1x3xf32>, vector<3x48xf32>, vector<1x48xf32> -> vector<1x48xf32>
    %c0_87 = arith.constant 0 : index
    %c0_88 = arith.constant 0 : index
    %c0_89 = arith.constant 0 : index
    %89 = vector.load %arg12[%c0_87, %c0_88, %c0_89] : memref<3x48x16xf32, #tpu.memory_space<vmem>>, vector<1x48x16xf32>
    %90 = vector.shape_cast %89 : vector<1x48x16xf32> to vector<48x16xf32>
    %cst_90 = arith.constant dense<0.000000e+00> : vector<1x16xf32>
    %91 = tpu.matmul %88, %90, %cst_90 {dimension_numbers = #tpu.dot_dimension_numbers<[1], [0], [0], [1], [0, 0, 1, 1], [], []>} : vector<1x48xf32>, vector<48x16xf32>, vector<1x16xf32> -> vector<1x16xf32>
    %c1_91 = arith.constant 1 : index
    %c0_92 = arith.constant 0 : index
    %c0_93 = arith.constant 0 : index
    %92 = vector.load %arg11[%c1_91, %c0_92, %c0_93] : memref<3x1x3xf32, #tpu.memory_space<vmem>>, vector<1x1x3xf32>
    %93 = vector.shape_cast %92 : vector<1x1x3xf32> to vector<1x3xf32>
    %cst_94 = arith.constant dense<0.000000e+00> : vector<1x48xf32>
    %94 = tpu.matmul %93, %85, %cst_94 {dimension_numbers = #tpu.dot_dimension_numbers<[1], [0], [0], [1], [0, 0, 1, 1], [], []>} : vector<1x3xf32>, vector<3x48xf32>, vector<1x48xf32> -> vector<1x48xf32>
    %c1_95 = arith.constant 1 : index
    %c0_96 = arith.constant 0 : index
    %c0_97 = arith.constant 0 : index
    %95 = vector.load %arg12[%c1_95, %c0_96, %c0_97] : memref<3x48x16xf32, #tpu.memory_space<vmem>>, vector<1x48x16xf32>
    %96 = vector.shape_cast %95 : vector<1x48x16xf32> to vector<48x16xf32>
    %cst_98 = arith.constant dense<0.000000e+00> : vector<1x16xf32>
    %97 = tpu.matmul %94, %96, %cst_98 {dimension_numbers = #tpu.dot_dimension_numbers<[1], [0], [0], [1], [0, 0, 1, 1], [], []>} : vector<1x48xf32>, vector<48x16xf32>, vector<1x16xf32> -> vector<1x16xf32>
    %98 = arith.addf %91, %97 : vector<1x16xf32>
    %c2_99 = arith.constant 2 : index
    %c0_100 = arith.constant 0 : index
    %c0_101 = arith.constant 0 : index
    %99 = vector.load %arg11[%c2_99, %c0_100, %c0_101] : memref<3x1x3xf32, #tpu.memory_space<vmem>>, vector<1x1x3xf32>
    %100 = vector.shape_cast %99 : vector<1x1x3xf32> to vector<1x3xf32>
    %cst_102 = arith.constant dense<0.000000e+00> : vector<1x48xf32>
    %101 = tpu.matmul %100, %85, %cst_102 {dimension_numbers = #tpu.dot_dimension_numbers<[1], [0], [0], [1], [0, 0, 1, 1], [], []>} : vector<1x3xf32>, vector<3x48xf32>, vector<1x48xf32> -> vector<1x48xf32>
    %c2_103 = arith.constant 2 : index
    %c0_104 = arith.constant 0 : index
    %c0_105 = arith.constant 0 : index
    %102 = vector.load %arg12[%c2_103, %c0_104, %c0_105] : memref<3x48x16xf32, #tpu.memory_space<vmem>>, vector<1x48x16xf32>
    %103 = vector.shape_cast %102 : vector<1x48x16xf32> to vector<48x16xf32>
    %cst_106 = arith.constant dense<0.000000e+00> : vector<1x16xf32>
    %104 = tpu.matmul %101, %103, %cst_106 {dimension_numbers = #tpu.dot_dimension_numbers<[1], [0], [0], [1], [0, 0, 1, 1], [], []>} : vector<1x48xf32>, vector<48x16xf32>, vector<1x16xf32> -> vector<1x16xf32>
    %105 = arith.addf %98, %104 : vector<1x16xf32>
    %c0_107 = arith.constant 0 : index
    %c0_108 = arith.constant 0 : index
    %106 = vector.load %arg13[%c0_107, %c0_108] : memref<1x16xf32, #tpu.memory_space<vmem>>, vector<1x16xf32>
    %107 = arith.addf %105, %106 : vector<1x16xf32>
    %cst_109 = arith.constant 0.000000e+00 : f32
    %108 = vector.broadcast %cst_109 : f32 to vector<1x16xf32>
    %109 = arith.cmpf oge, %107, %108 : vector<1x16xf32>
    %cst_110 = arith.constant 0.00999999977 : f32
    %110 = vector.broadcast %cst_110 : f32 to vector<1x16xf32>
    %111 = arith.mulf %110, %107 : vector<1x16xf32>
    %112 = arith.select %109, %107, %111 : vector<1x16xi1>, vector<1x16xf32>
    %c0_111 = arith.constant 0 : index
    %c0_112 = arith.constant 0 : index
    %c0_113 = arith.constant 0 : index
    %113 = vector.load %arg14[%c0_111, %c0_112, %c0_113] : memref<1x1x16xf32, #tpu.memory_space<vmem>>, vector<1x1x16xf32>
    %114 = vector.shape_cast %113 : vector<1x1x16xf32> to vector<1x16xf32>
    %115 = vector.shape_cast %112 : vector<1x16xf32> to vector<1x1x16xf32>
    tpu.vector_store %arg14[%c0_111, %c0_112, %c0_113], %115 {strides = array<i32>} : memref<1x1x16xf32, #tpu.memory_space<vmem>>, vector<1x1x16xf32>,
    return
  }
  func.func @transform_0(%arg0: i32) -> (i32, i32, i32) {
    %c0_i32 = arith.constant 0 : i32
    %c0_i32_0 = arith.constant 0 : i32
    %c0_i32_1 = arith.constant 0 : i32
    return %arg0, %c0_i32, %c0_i32_0 : i32, i32, i32
  }
  func.func @transform_1(%arg0: i32) -> (i32, i32, i32) {
    %c0_i32 = arith.constant 0 : i32
    %c0_i32_0 = arith.constant 0 : i32
    %c0_i32_1 = arith.constant 0 : i32
    %c0_i32_2 = arith.constant 0 : i32
    return %c0_i32, %c0_i32_0, %c0_i32_1 : i32, i32, i32
  }
  func.func @transform_2(%arg0: i32) -> (i32, i32, i32) {
    %c0_i32 = arith.constant 0 : i32
    %c0_i32_0 = arith.constant 0 : i32
    %c0_i32_1 = arith.constant 0 : i32
    %c0_i32_2 = arith.constant 0 : i32
    return %c0_i32, %c0_i32_0, %c0_i32_1 : i32, i32, i32
  }
  func.func @transform_3(%arg0: i32) -> (i32, i32) {
    %c0_i32 = arith.constant 0 : i32
    %c0_i32_0 = arith.constant 0 : i32
    %c0_i32_1 = arith.constant 0 : i32
    return %c0_i32, %c0_i32_0 : i32, i32
  }
  func.func @transform_4(%arg0: i32) -> (i32, i32, i32) {
    %c0_i32 = arith.constant 0 : i32
    %c0_i32_0 = arith.constant 0 : i32
    %c0_i32_1 = arith.constant 0 : i32
    %c0_i32_2 = arith.constant 0 : i32
    return %c0_i32, %c0_i32_0, %c0_i32_1 : i32, i32, i32
  }
  func.func @transform_5(%arg0: i32) -> (i32, i32, i32) {
    %c0_i32 = arith.constant 0 : i32
    %c0_i32_0 = arith.constant 0 : i32
    %c0_i32_1 = arith.constant 0 : i32
    %c0_i32_2 = arith.constant 0 : i32
    return %c0_i32, %c0_i32_0, %c0_i32_1 : i32, i32, i32
  }
  func.func @transform_6(%arg0: i32) -> (i32, i32) {
    %c0_i32 = arith.constant 0 : i32
    %c0_i32_0 = arith.constant 0 : i32
    %c0_i32_1 = arith.constant 0 : i32
    return %c0_i32, %c0_i32_0 : i32, i32
  }
  func.func @transform_7(%arg0: i32) -> (i32, i32, i32) {
    %c0_i32 = arith.constant 0 : i32
    %c0_i32_0 = arith.constant 0 : i32
    %c0_i32_1 = arith.constant 0 : i32
    %c0_i32_2 = arith.constant 0 : i32
    return %c0_i32, %c0_i32_0, %c0_i32_1 : i32, i32, i32
  }
  func.func @transform_8(%arg0: i32) -> (i32, i32, i32) {
    %c0_i32 = arith.constant 0 : i32
    %c0_i32_0 = arith.constant 0 : i32
    %c0_i32_1 = arith.constant 0 : i32
    %c0_i32_2 = arith.constant 0 : i32
    return %c0_i32, %c0_i32_0, %c0_i32_1 : i32, i32, i32
  }
  func.func @transform_9(%arg0: i32) -> (i32, i32) {
    %c0_i32 = arith.constant 0 : i32
    %c0_i32_0 = arith.constant 0 : i32
    %c0_i32_1 = arith.constant 0 : i32
    return %c0_i32, %c0_i32_0 : i32, i32
  }
  func.func @transform_10(%arg0: i32) -> (i32, i32, i32) {
    %c0_i32 = arith.constant 0 : i32
    %c0_i32_0 = arith.constant 0 : i32
    %c0_i32_1 = arith.constant 0 : i32
    %c0_i32_2 = arith.constant 0 : i32
    return %c0_i32, %c0_i32_0, %c0_i32_1 : i32, i32, i32
  }
  func.func @transform_11(%arg0: i32) -> (i32, i32, i32) {
    %c0_i32 = arith.constant 0 : i32
    %c0_i32_0 = arith.constant 0 : i32
    %c0_i32_1 = arith.constant 0 : i32
    %c0_i32_2 = arith.constant 0 : i32
    return %c0_i32, %c0_i32_0, %c0_i32_1 : i32, i32, i32
  }
  func.func @transform_12(%arg0: i32) -> (i32, i32) {
    %c0_i32 = arith.constant 0 : i32
    %c0_i32_0 = arith.constant 0 : i32
    %c0_i32_1 = arith.constant 0 : i32
    return %c0_i32, %c0_i32_0 : i32, i32
  }
  func.func @transform_13(%arg0: i32) -> (i32, i32, i32) {
    %c0_i32 = arith.constant 0 : i32
    %c0_i32_0 = arith.constant 0 : i32
    %c0_i32_1 = arith.constant 0 : i32
    return %arg0, %c0_i32, %c0_i32_0 : i32, i32, i32
  }
}

</mosaic_0001>

<bundles_post_ra>
// kernel: tpu_custom_call.1
= control target key start
LH: loop header
LB: loop body
LE: loop exit
PB: predicated region body
PF: predicated region fallthrough
CT: control target
= control target key end

     0   :  { %s4165_s0 = inlined_call_operand.vmem [shape: f32[2,32,128], index: 0, kind: input, shape index: {}]   ;;  %s4166_s1 = inlined_call_operand.vmem [shape: f32[3,15,32], index: 1, kind: input, shape index: {}]   ;;  %s4167_s2 = inlined_call_operand.vmem [shape: f32[3,128,120], index: 2, kind: input, shape index: {}]   ;;  %s4168_s3 = inlined_call_operand.vmem [shape: f32[1,120], index: 3, kind: input, shape index: {}]   ;;  %s4169_s4 = inlined_call_operand.vmem [shape: f32[3,7,15], index: 4, kind: input, shape index: {}]   ;;  %s4170_s5 = inlined_call_operand.vmem [shape: f32[3,120,56], index: 5, kind: input, shape index: {}]   ;;  %s4171_s6 = inlined_call_operand.vmem [shape: f32[1,56], index: 6, kind: input, shape index: {}]   ;;  %s4172_s7 = inlined_call_operand.vmem [shape: f32[3,3,7], index: 7, kind: input, shape index: {}]   ;;  %s4173_s8 = inlined_call_operand.vmem [shape: f32[3,56,48], index: 8, kind: input, shape index: {}]   ;;  %s4174_s9 = inlined_call_operand.vmem [shape: f32[1,48], index: 9, kind: input, shape index: {}]   ;;  %s4175_s10 = inlined_call_operand.vmem [shape: f32[3,1,3], index: 10, kind: input, shape index: {}]   ;;  %s4176_s11 = inlined_call_operand.vmem [shape: f32[3,48,16], index: 11, kind: input, shape index: {}]   ;;  %s4177_s12 = inlined_call_operand.vmem [shape: f32[1,16], index: 12, kind: input, shape index: {}]   ;;  %s4178_s13 = inlined_call_operand.hbm [shape: f32[2,1,16], index: 13, kind: output, shape index: {}]  }
   0x1   :  { %4179 = sst [smem:[#allocation6_spill]] %s4165_s0 }
   0x2   :  { %4180 = sst [smem:[#allocation7_spill]] %s4166_s1 }
   0x3   :  { %18 = vsyncpa [#allocation3], 0 }
   0x4   :  { %20 = vsyncpa [#allocation3 + $0x1], 0  ;;  %s3412_s25 = smov 0   ;;  %s3414_s26 = smov 0  }
   0x5   :  { %s3416_s27 = smov 0   ;;  %s3418_s28 = smov 0  }
   0x6 LB: > { %s3433_s29 = sadd.s32 4294967295, %s3337_s28   ;;  %s2522_s30 = sadd.s32 4294967294, %s3337_s28   ;;  %s3337_s28 = sphi %s3418_s28, %s4190_s28   ;;  %s3333_s27 = sphi %s3416_s27, %s4189_s27   ;;  %s3329_s26 = sphi %s3414_s26, %s4188_s26   ;;  %s3325_s25 = sphi %s3412_s25, %s4187_s25  }
   0x7   : > { %s3437_s14 = sadd.s32 1, %s3337_s28   ;;  %s311_s15 = sadd.s32 1, %s3333_s27 }
   0x8   : > { %s308_s16 = ssub.s32 %s3337_s28, %s3437_s14  ;;  %p321_p0 = scmp.ne.s32.totalorder %s3333_s27, %s3329_s26 }
   0x9   : > { %p309_p1 = scmp.eq.s32.totalorder %s308_s16, 0  ;;  %p322_p2 = scmp.eq.s32.totalorder %s3433_s29, 1 }
   0xa   : > { %p327_p3 = scmp.ne.s32.totalorder %s3329_s26, %s3325_s25  ;;  %p328_p4 = scmp.eq.s32.totalorder %s2522_s30, 1 }
   0xb   : > { %s3448_s17 = scalar_select %p309_p1, %s3333_s27, %s311_s15  }
   0xc   : > { %p3450_p5 = por %p322_p2, %p321_p0  ;;  %p3454_p6 = por %p328_p4, %p327_p3 }
   0xd   : > { %4181 = sst [smem:[#allocation5_spill]] %s3448_s17  ;;  %p2525_p7 = scmp.ge.s32.totalorder %s3337_s28, 1 }
   0xe   : > { %p390_p8 = scmp.lt.s32.totalorder %s3337_s28, 3 }
  0x10   : > { %p391_p9 = pnand %p2525_p7, %p390_p8 }
  0x11   : > { %p433_p10 = scmp.lt.s32.totalorder (!%p391_p9), %s3433_s29, 1  ;;  %s4184_s1 = sld [smem:[#allocation7_spill]] (!%p391_p9) }
  0x12   : > { %394 = sbr.rel (%p391_p9) target bundleno = 2432 (0x980), region = 72  ;;  %s4185_s0 = sld [smem:[#allocation6_spill]] (!%p391_p9) }
  0x13   : > { %s431_s16 = sand.u32 (!%p391_p9), 1, %s3329_s26   ;;  %s2662_s22 = sshll.u32 (!%p391_p9), %s3433_s29, 4 }
  0x14   : > { %s432_s23 = scalar_lea.vmem (!%p391_p9), [#allocation2], %s431_s16  ;;  %s4130_s15 = scalar_lea.hbm (!%p391_p9), %s4178_s13, %s2662_s22 }
  0x15   : > { %s2455_s20 = scalar_lea.sflag (!%p391_p9), [#allocation3], %s431_s16 }
  0x17   : > { %v442_v0 = vld [vmem:[%s4184_s1] sm:$0xff]  ;;  %vm444_vm0 = vcmask 261120   ;;  %v2530_v1 = vld [vmem:[%s4184_s1 + $0x10] sm:$0xff]  ;;  %s434_s24 = scalar_select %p433_p10, %s3433_s29, 1  ;;  %v443_v6 = vld [vmem:[%s4184_s1 + $0x8] sm:$0x7f] }
  0x18   : > { %2860 = vmatprep.mubr.msk.f32.mxu0 %vm444_vm0, %v442_v0  ;;  %2871 = vmatprep.mubr.msk.f32.mxu1 %vm444_vm0, %v2530_v1  ;;  %v2531_v7 = vld [vmem:[%s4184_s1 + $0x18] sm:$0x7f]  ;;  %v2548_v10 = vld [vmem:[%s4167_s2 + $0xf0] sm:$0xff]  ;;  %v2547_v12 = vld [vmem:[%s4167_s2 + $0xe8] sm:$0xff]  ;;  %vm3340_vm1 = vmmov 0   ;;  %vm991_vm3 = vcmask 1046528  }
  0x19   : > { %s2665_s30 = sshll.u32 %s434_s24, 5  ;;  %v2549_v8 = vld [vmem:[%s4167_s2 + $0xf8] sm:$0xff]  ;;  %v540_v11 = vld [vmem:[%s4167_s2 + $0x70] sm:$0xff]  ;;  %v539_v13 = vld [vmem:[%s4167_s2 + $0x68] sm:$0xff]  ;;  %vm987_vm5 = vcmask 121856   ;;  %vm1171_vm6 = vcmask 982016  }
  0x1a   : > { %s437_s17 = scalar_lea.vmem %s4185_s0, %s2665_s30  ;;  %v541_v9 = vld [vmem:[%s4167_s2 + $0x78] sm:$0xff]  ;;  %v2546_v14 = vld [vmem:[%s4167_s2 + $0xe0] sm:$0xff]  ;;  %v2544_v18 = vld [vmem:[%s4167_s2 + $0xd0] sm:$0xff]  ;;  %vm1495_vm8 = vcmask 56320   ;;  %vm1662_vm9 = vcmask 457728   ;;  %vm1982_vm11 = vcmask 1042432  }
  0x1b   : > { %v3473_v2 = vld [vmem:[%s437_s17 + $0x18] sm:$0xff]  ;;  %v3475_v3 = vld [vmem:[%s437_s17 + $0x10] sm:$0xff]  ;;  %v3481_v4 = vld [vmem:[%s437_s17 + $0x8] sm:$0xff]  ;;  %vm1978_vm12 = vcmask 23552   ;;  %vm2144_vm13 = vcmask 392192   ;;  %vm2452_vm15 = vcmask 122880  }
  0x1c   : > { %2852 = vmatprep.subr.mxu0 %v3473_v2  ;;  %2863 = vmatprep.subr.mxu1 %v3473_v2  ;;  %v3487_v5 = vld [vmem:[%s437_s17] sm:$0xff]  ;;  %v2545_v16 = vld [vmem:[%s4167_s2 + $0xd8] sm:$0xff]  ;;  %v536_v19 = vld [vmem:[%s4167_s2 + $0x50] sm:$0xff]  ;;  %s2467_s17 = sshll.u32 %s432_s23, 4  ;;  %s3341_s29 = smov [#allocation2]   ;;  %s2468_s17 = int_to_ptr.vmem [resolvable:$true] %s2467_s17 }
  0x1d   : > { %2853 = vmatpush3.msra.mxu0 %v3473_v2  ;;  %2864 = vmatpush3.msra.mxu1 %v3473_v2  ;;  %v538_v15 = vld [vmem:[%s4167_s2 + $0x60] sm:$0xff]  ;;  %v537_v17 = vld [vmem:[%s4167_s2 + $0x58] sm:$0xff]  ;;  %v2543_v20 = vld [vmem:[%s4167_s2 + $0xc8] sm:$0xff]  ;;  %s3277_s21 = scalar_lea.vmem %s2468_s17, 16  ;;  %s3281_s0 = sshll.u32 %s3341_s29, 4  ;;  %s3282_s0 = int_to_ptr.vmem [resolvable:$false] %s3281_s0 }
  0x1e   : > { %2854 = vmatprep.subr.mxu0 %v3475_v3  ;;  %2865 = vmatprep.subr.mxu1 %v3475_v3  ;;  %v535_v21 = vld [vmem:[%s4167_s2 + $0x48] sm:$0xff]  ;;  %v2542_v22 = vld [vmem:[%s4167_s2 + $0xc0] sm:$0xff]  ;;  %v2541_v24 = vld [vmem:[%s4167_s2 + $0xb8] sm:$0xff]  ;;  %p3278_p11 = scmp.ne.s32.totalorder %s2468_s17, %s3277_s21  ;;  %p3284_p0 = scmp.lt.s32.totalorder %s2468_s17, %s3282_s0 }
  0x1f   : > { %2855 = vmatpush3.msra.mxu0 %v3475_v3  ;;  %2866 = vmatpush3.msra.mxu1 %v3475_v3  ;;  %v534_v23 = vld [vmem:[%s4167_s2 + $0x40] sm:$0xff]  ;;  %v533_v25 = vld [vmem:[%s4167_s2 + $0x38] sm:$0xff]  ;;  %v2540_v26 = vld [vmem:[%s4167_s2 + $0xb0] sm:$0xff] }
  0x20   : > { %2856 = vmatprep.subr.mxu0 %v3481_v4  ;;  %2867 = vmatprep.subr.mxu1 %v3481_v4  ;;  %v532_v27 = vld [vmem:[%s4167_s2 + $0x30] sm:$0xff]  ;;  %v2539_v28 = vld [vmem:[%s4167_s2 + $0xa8] sm:$0xff]  ;;  %v2538_v30 = vld [vmem:[%s4167_s2 + $0xa0] sm:$0xff]  ;;  %p3279_p12 = pnand %p3278_p11, %p3450_p5 }
  0x21   : > { %2857 = vmatpush3.msra.mxu0 %v3481_v4  ;;  %2868 = vmatpush3.msra.mxu1 %v3481_v4  ;;  %v531_v29 = vld [vmem:[%s4167_s2 + $0x28] sm:$0xff]  ;;  %v530_v31 = vld [vmem:[%s4167_s2 + $0x20] sm:$0xff]  ;;  %v2537_v32 = vld [vmem:[%s4167_s2 + $0x98] sm:$0xff] }
  0x22   : > { %2858 = vmatprep.subr.mxu0 %v3487_v5  ;;  %2869 = vmatprep.subr.mxu1 %v3487_v5  ;;  %v529_v33 = vld [vmem:[%s4167_s2 + $0x18] sm:$0xff]  ;;  %v2536_v34 = vld [vmem:[%s4167_s2 + $0x90] sm:$0xff]  ;;  %v2535_v36 = vld [vmem:[%s4167_s2 + $0x88] sm:$0xff]  ;;  %p3280_p13 = pneg %p3279_p12 }
  0x23   : > { %2859 = vmatpush3.msra.mxu0 %v3487_v5  ;;  %2870 = vmatpush3.msra.mxu1 %v3487_v5  ;;  %v528_v35 = vld [vmem:[%s4167_s2 + $0x10] sm:$0xff]  ;;  %v527_v37 = vld [vmem:[%s4167_s2 + $0x8] sm:$0xff]  ;;  %v2534_v38 = vld [vmem:[%s4167_s2 + $0x80] sm:$0xff] }
  0x24   : > { %2861 = vmatmul.mubr.msk.f32.vlgmr.msra.gmra.mxu0 %vm444_vm0, %v443_v6  ;;  %2872 = vmatmul.mubr.msk.f32.vlgmr.msra.gmra.mxu1 %vm444_vm0, %v2531_v7  ;;  %v526_v39 = vld [vmem:[%s4167_s2] sm:$0xff]  ;;  %v2569_v40 = vld [vmem:[%s4167_s2 + $0x178] sm:$0xff]  ;;  %v2568_v46 = vld [vmem:[%s4167_s2 + $0x170] sm:$0xff] }
  0x25   : > { %2874 = vmatprep.subr.mxu0 %v2549_v8  ;;  %2909 = vmatprep.subr.mxu1 %v541_v9  ;;  %v2550_v45 = vld [vmem:[%s4184_s1 + $0x20] sm:$0xff]  ;;  %v2567_v47 = vld [vmem:[%s4167_s2 + $0x168] sm:$0xff]  ;;  %v2565_v50 = vld [vmem:[%s4167_s2 + $0x158] sm:$0xff] }
  0x26   : > { %2875 = vmatpush3.msra.mxu0 %v2549_v8  ;;  %2910 = vmatpush3.msra.mxu1 %v541_v9  ;;  %v2566_v48 = vld [vmem:[%s4167_s2 + $0x160] sm:$0xff]  ;;  %v2551_v49 = vld [vmem:[%s4184_s1 + $0x28] sm:$0x7f]  ;;  %v2564_v51 = vld [vmem:[%s4167_s2 + $0x150] sm:$0xff]  ;;  %s3283_s1 = scalar_lea.vmem %s3282_s0, 32 }
  0x27   : > { %2876 = vmatprep.subr.mxu0 %v2548_v10  ;;  %2911 = vmatprep.subr.mxu1 %v540_v11  ;;  %v2563_v52 = vld [vmem:[%s4167_s2 + $0x148] sm:$0xff]  ;;  %v2562_v53 = vld [vmem:[%s4167_s2 + $0x140] sm:$0xff]  ;;  %v2561_v54 = vld [vmem:[%s4167_s2 + $0x138] sm:$0xff]  ;;  %p3285_p1 = scmp.lt.s32.totalorder %s3283_s1, %s3277_s21 }
  0x28   : > { %2877 = vmatpush3.msra.mxu0 %v2548_v10  ;;  %2912 = vmatpush3.msra.mxu1 %v540_v11  ;;  %v2560_v55 = vld [vmem:[%s4167_s2 + $0x130] sm:$0xff]  ;;  %v2559_v56 = vld [vmem:[%s4167_s2 + $0x128] sm:$0xff]  ;;  %v2558_v57 = vld [vmem:[%s4167_s2 + $0x120] sm:$0xff] }
  0x29   : > { %2878 = vmatprep.subr.mxu0 %v2547_v12  ;;  %2913 = vmatprep.subr.mxu1 %v539_v13  ;;  %v2557_v58 = vld [vmem:[%s4167_s2 + $0x118] sm:$0xff]  ;;  %v2556_v59 = vld [vmem:[%s4167_s2 + $0x110] sm:$0xff]  ;;  %v2555_v60 = vld [vmem:[%s4167_s2 + $0x108] sm:$0xff]  ;;  %p3286_p2 = por %p3285_p1, %p3284_p0 }
  0x2a   : > { %2879 = vmatpush3.msra.mxu0 %v2547_v12  ;;  %2914 = vmatpush3.msra.mxu1 %v539_v13  ;;  %v2554_v61 = vld [vmem:[%s4167_s2 + $0x100] sm:$0xff]  ;;  %v1076_v6 = vld [vmem:[%s4170_s5 + $0x58] sm:$0xff]  ;;  %v1075_v7 = vld [vmem:[%s4170_s5 + $0x50] sm:$0xff] }
  0x2b   : > { %2880 = vmatprep.subr.mxu0 %v2546_v14  ;;  %2915 = vmatprep.subr.mxu1 %v538_v15  ;;  %v1074_v8 = vld [vmem:[%s4170_s5 + $0x48] sm:$0xff]  ;;  %v1073_v9 = vld [vmem:[%s4170_s5 + $0x40] sm:$0xff]  ;;  %v1072_v10 = vld [vmem:[%s4170_s5 + $0x38] sm:$0xff]  ;;  %p3287_p3 = pnand %p3286_p2, %p3280_p13 }
  0x2c   : > { %2881 = vmatpush3.msra.mxu0 %v2546_v14  ;;  %2916 = vmatpush3.msra.mxu1 %v538_v15  ;;  %v1071_v11 = vld [vmem:[%s4170_s5 + $0x30] sm:$0xff]  ;;  %v1070_v12 = vld [vmem:[%s4170_s5 + $0x28] sm:$0xff]  ;;  %v1069_v13 = vld [vmem:[%s4170_s5 + $0x20] sm:$0xff] }
  0x2d   : > { %2882 = vmatprep.subr.mxu0 %v2545_v16  ;;  %2917 = vmatprep.subr.mxu1 %v537_v17  ;;  %v1068_v14 = vld [vmem:[%s4170_s5 + $0x18] sm:$0xff]  ;;  %v1067_v15 = vld [vmem:[%s4170_s5 + $0x10] sm:$0xff] }
  0x2e   : > { %2883 = vmatpush3.msra.mxu0 %v2545_v16  ;;  %2918 = vmatpush3.msra.mxu1 %v537_v17  ;;  %v1066_v16 = vld [vmem:[%s4170_s5 + $0x8] sm:$0xff] }
  0x2f   : > { %2884 = vmatprep.subr.mxu0 %v2544_v18  ;;  %2919 = vmatprep.subr.mxu1 %v536_v19 }
  0x30   : > { %2885 = vmatpush3.msra.mxu0 %v2544_v18  ;;  %2920 = vmatpush3.msra.mxu1 %v536_v19 }
  0x31   : > { %2886 = vmatprep.subr.mxu0 %v2543_v20  ;;  %2921 = vmatprep.subr.mxu1 %v535_v21 }
  0x32   : > { %2887 = vmatpush3.msra.mxu0 %v2543_v20  ;;  %2922 = vmatpush3.msra.mxu1 %v535_v21  ;;  %v2570_v21 = vld [vmem:[%s4168_s3] ss:$0 sm:$0xff] }
  0x33   : > { %2888 = vmatprep.subr.mxu0 %v2542_v22  ;;  %2923 = vmatprep.subr.mxu1 %v534_v23 }
  0x34   : > { %2889 = vmatpush3.msra.mxu0 %v2542_v22  ;;  %2924 = vmatpush3.msra.mxu1 %v534_v23 }
  0x35   : > { %2890 = vmatprep.subr.mxu0 %v2541_v24  ;;  %2925 = vmatprep.subr.mxu1 %v533_v25 }
  0x36   : > { %2891 = vmatpush3.msra.mxu0 %v2541_v24  ;;  %2926 = vmatpush3.msra.mxu1 %v533_v25 }
  0x37   : > { %2892 = vmatprep.subr.mxu0 %v2540_v26  ;;  %2927 = vmatprep.subr.mxu1 %v532_v27 }
  0x38   : > { %2893 = vmatpush3.msra.mxu0 %v2540_v26  ;;  %2928 = vmatpush3.msra.mxu1 %v532_v27 }
  0x39   : > { %2894 = vmatprep.subr.mxu0 %v2539_v28  ;;  %2929 = vmatprep.subr.mxu1 %v531_v29 }
  0x3a   : > { %2895 = vmatpush3.msra.mxu0 %v2539_v28  ;;  %2930 = vmatpush3.msra.mxu1 %v531_v29 }
  0x3b   : > { %2896 = vmatprep.subr.mxu0 %v2538_v30  ;;  %2931 = vmatprep.subr.mxu1 %v530_v31 }
  0x3c   : > { %2897 = vmatpush3.msra.mxu0 %v2538_v30  ;;  %2932 = vmatpush3.msra.mxu1 %v530_v31  ;;  %v986_v31 = vld [vmem:[%s4169_s4] sm:$0x7f] }
  0x3d   : > { %2898 = vmatprep.subr.mxu0 %v2537_v32  ;;  %2933 = vmatprep.subr.mxu1 %v529_v33 }
  0x3e   : > { %2899 = vmatpush3.msra.mxu0 %v2537_v32  ;;  %2934 = vmatpush3.msra.mxu1 %v529_v33  ;;  %v2573_v33 = vld [vmem:[%s4169_s4 + $0x8] sm:$0x7f] }
  0x3f   : > { %2900 = vmatprep.subr.mxu0 %v2536_v34  ;;  %2935 = vmatprep.subr.mxu1 %v528_v35 }
  0x40   : > { %2901 = vmatpush3.msra.mxu0 %v2536_v34  ;;  %2936 = vmatpush3.msra.mxu1 %v528_v35  ;;  %v2590_v34 = vld [vmem:[%s4170_s5 + $0xe8] sm:$0xff]  ;;  %v2589_v35 = vld [vmem:[%s4170_s5 + $0xe0] sm:$0xff] }
  0x41   : > { %2902 = vmatprep.subr.mxu0 %v2535_v36  ;;  %2937 = vmatprep.subr.mxu1 %v527_v37 }
  0x42   : > { %2903 = vmatpush3.msra.mxu0 %v2535_v36  ;;  %2938 = vmatpush3.msra.mxu1 %v527_v37  ;;  %v2588_v36 = vld [vmem:[%s4170_s5 + $0xd8] sm:$0xff]  ;;  %v2587_v37 = vld [vmem:[%s4170_s5 + $0xd0] sm:$0xff] }
  0x43   : > { %2904 = vmatprep.subr.mxu0 %v2534_v38  ;;  %2939 = vmatprep.subr.mxu1 %v526_v39 }
  0x44   : > { %2905 = vmatpush3.msra.mxu0 %v2534_v38  ;;  %2940 = vmatpush3.msra.mxu1 %v526_v39  ;;  %v2586_v38 = vld [vmem:[%s4170_s5 + $0xc8] sm:$0xff]  ;;  %v2585_v39 = vld [vmem:[%s4170_s5 + $0xc0] sm:$0xff] }
  0x45   : > { %2944 = vmatprep.subr.mxu0 %v3473_v2  ;;  %2955 = vmatprep.subr.mxu1 %v2569_v40 }
  0xe4   : > { %v2862_v41 = vpop.f32.mrf.mxu0  ;;  %v2873_v42 = vpop.f32.mrf.mxu1 }
  0xe6   : > { %v517_v43 = vpop.f32.mrf.mxu0  ;;  %v617_v44 = vpop.f32.mrf.mxu1 }
  0xe7   : > { %2906 = vmatprep.mubr.f32.mxu0 %v617_v44  ;;  %2941 = vmatprep.mubr.f32.mxu1 %v517_v43  ;;  %v2581_v43 = vld [vmem:[%s4170_s5 + $0xa0] sm:$0xff]  ;;  %v2580_v44 = vld [vmem:[%s4170_s5 + $0x98] sm:$0xff] }
  0xe8   : > { %2907 = vmatmul.mubr.f32.vlgmr.msra.gmra.mxu0 %v2873_v42  ;;  %2942 = vmatmul.mubr.f32.vlgmr.msra.gmra.mxu1 %v2862_v41  ;;  %v2583_v41 = vld [vmem:[%s4170_s5 + $0xb0] sm:$0xff]  ;;  %v2582_v42 = vld [vmem:[%s4170_s5 + $0xa8] sm:$0xff] }
  0xe9   : > { %2945 = vmatpush3.msra.mxu0 %v3473_v2  ;;  %2952 = vmatprep.mubr.msk.f32.mxu0 %vm444_vm0, %v2550_v45  ;;  %v3339_v2 = vmov 0.0   ;;  %v2579_v45 = vld [vmem:[%s4170_s5 + $0x90] sm:$0xff] }
  0xea   : > { %2946 = vmatprep.subr.mxu0 %v3475_v3  ;;  %2956 = vmatpush3.msra.mxu1 %v2569_v40  ;;  %v2584_v40 = vld [vmem:[%s4170_s5 + $0xb8] sm:$0xff] }
  0xeb   : > { %2947 = vmatpush3.msra.mxu0 %v3475_v3  ;;  %2957 = vmatprep.subr.mxu1 %v2568_v46  ;;  %v1079_v3 = vld [vmem:[%s4170_s5 + $0x70] sm:$0xff] }
  0xec   : > { %2948 = vmatprep.subr.mxu0 %v3481_v4  ;;  %2958 = vmatpush3.msra.mxu1 %v2568_v46  ;;  %v2578_v46 = vld [vmem:[%s4170_s5 + $0x88] sm:$0xff] }
  0xed   : > { %2949 = vmatpush3.msra.mxu0 %v3481_v4  ;;  %2959 = vmatprep.subr.mxu1 %v2567_v47  ;;  %v1078_v4 = vld [vmem:[%s4170_s5 + $0x68] sm:$0xff] }
  0xee   : > { %2950 = vmatprep.subr.mxu0 %v3487_v5  ;;  %2960 = vmatpush3.msra.mxu1 %v2567_v47  ;;  %v1065_v47 = vld [vmem:[%s4170_s5] sm:$0xff] }
  0xef   : > { %2951 = vmatpush3.msra.mxu0 %v3487_v5  ;;  %2961 = vmatprep.subr.mxu1 %v2566_v48  ;;  %v1077_v5 = vld [vmem:[%s4170_s5 + $0x60] sm:$0xff] }
  0xf0   : > { %2953 = vmatmul.mubr.msk.f32.vlgmr.msra.gmra.mxu0 %vm444_vm0, %v2551_v49  ;;  %2962 = vmatpush3.msra.mxu1 %v2566_v48  ;;  %v2577_v48 = vld [vmem:[%s4170_s5 + $0x80] sm:$0xff]  ;;  %v2576_v49 = vld [vmem:[%s4170_s5 + $0x78] sm:$0xff] }
  0xf1   : > { %2963 = vmatprep.subr.mxu1 %v2565_v50  ;;  %2990 = vmatprep.subr.mxu0 %v3339_v2 }
  0xf2   : > { %2964 = vmatpush3.msra.mxu1 %v2565_v50  ;;  %2994 = vmatprep.mubr.msk.f32.mxu0 %vm3340_vm1, %v3339_v2 }
  0xf3   : > { %2965 = vmatprep.subr.mxu1 %v2564_v51 }
  0xf4   : > { %2966 = vmatpush3.msra.mxu1 %v2564_v51 }
  0xf5   : > { %2967 = vmatprep.subr.mxu1 %v2563_v52 }
  0xf6   : > { %2968 = vmatpush3.msra.mxu1 %v2563_v52 }
  0xf7   : > { %2969 = vmatprep.subr.mxu1 %v2562_v53 }
  0xf8   : > { %2970 = vmatpush3.msra.mxu1 %v2562_v53 }
  0xf9   : > { %2971 = vmatprep.subr.mxu1 %v2561_v54 }
  0xfa   : > { %2972 = vmatpush3.msra.mxu1 %v2561_v54  ;;  %v2593_v54 = vld [vmem:[%s4169_s4 + $0x10] sm:$0x7f] }
  0xfb   : > { %2973 = vmatprep.subr.mxu1 %v2560_v55 }
  0xfc   : > { %2974 = vmatpush3.msra.mxu1 %v2560_v55  ;;  %v2610_v55 = vld [vmem:[%s4170_s5 + $0x160] sm:$0xff] }
  0xfd   : > { %2975 = vmatprep.subr.mxu1 %v2559_v56 }
  0xfe   : > { %2976 = vmatpush3.msra.mxu1 %v2559_v56  ;;  %v2609_v56 = vld [vmem:[%s4170_s5 + $0x158] sm:$0xff] }
  0xff   : > { %2977 = vmatprep.subr.mxu1 %v2558_v57 }
 0x100   : > { %2978 = vmatpush3.msra.mxu1 %v2558_v57  ;;  %v2608_v57 = vld [vmem:[%s4170_s5 + $0x150] sm:$0xff] }
 0x101   : > { %2979 = vmatprep.subr.mxu1 %v2557_v58 }
 0x102   : > { %2980 = vmatpush3.msra.mxu1 %v2557_v58  ;;  %v2607_v58 = vld [vmem:[%s4170_s5 + $0x148] sm:$0xff] }
 0x103   : > { %2981 = vmatprep.subr.mxu1 %v2556_v59 }
 0x104   : > { %2982 = vmatpush3.msra.mxu1 %v2556_v59  ;;  %v2606_v59 = vld [vmem:[%s4170_s5 + $0x140] sm:$0xff] }
 0x105   : > { %2983 = vmatprep.subr.mxu1 %v2555_v60 }
 0x106   : > { %2984 = vmatpush3.msra.mxu1 %v2555_v60  ;;  %v2605_v60 = vld [vmem:[%s4170_s5 + $0x138] sm:$0xff] }
 0x107   : > { %2985 = vmatprep.subr.mxu1 %v2554_v61 }
 0x108   : > { %2986 = vmatpush3.msra.mxu1 %v2554_v61  ;;  %v2604_v61 = vld [vmem:[%s4170_s5 + $0x130] sm:$0xff] }
 0x109   : > { %3037 = vmatprep.subr.mxu1 %v3339_v2 }
 0x1a8   : > { %v2908_v62 = vpop.f32.mrf.mxu0  ;;  %v2943_v17 = vpop.f32.mrf.mxu1 }
 0x1a9   : > { %v790_v19 = vadd.f32 %v2943_v17, %v2908_v62  ;;  %v2603_v62 = vld [vmem:[%s4170_s5 + $0x128] sm:$0xff] }
 0x1aa   : > { %v709_v63 = vpop.f32.mrf.mxu0  ;;  %v784_v18 = vpop.f32.mrf.mxu1 }
 0x1ab   : > { %v785_v22 = vadd.f32 %v784_v18, %v709_v63  ;;  %v2602_v63 = vld [vmem:[%s4170_s5 + $0x120] sm:$0xff] }
 0x1b0   : > { %v2954_v0 = vpop.f32.mrf.mxu0 }
 0x1b2   : > { %v868_v1 = vpop.f32.mrf.mxu0 }
 0x1b3   : > { %2987 = vmatprep.mubr.f32.mxu1 %v868_v1  ;;  %v2600_v1 = vld [vmem:[%s4170_s5 + $0x110] sm:$0xff] }
 0x1b4   : > { %2988 = vmatmul.mubr.f32.vlgmr.msra.gmra.mxu1 %v2954_v0  ;;  %v2601_v0 = vld [vmem:[%s4170_s5 + $0x118] sm:$0xff] }
 0x1b5   : > { %3067 = vmatprep.mubr.msk.f32.mxu1 %vm3340_vm1, %v3339_v2  ;;  %3038 = vmatpush3.msra.mxu1 %v1079_v3  ;;  %v2599_v3 = vld [vmem:[%s4170_s5 + $0x108] sm:$0xff] }
 0x1b6   : > { %3039 = vmatprep.subr.mxu1 %v3339_v2 }
 0x1b7   : > { %3040 = vmatpush3.msra.mxu1 %v1078_v4  ;;  %v2598_v4 = vld [vmem:[%s4170_s5 + $0x100] sm:$0xff] }
 0x1b8   : > { %3041 = vmatprep.subr.mxu1 %v3339_v2 }
 0x1b9   : > { %3042 = vmatpush3.msra.mxu1 %v1077_v5  ;;  %v2597_v5 = vld [vmem:[%s4170_s5 + $0xf8] sm:$0xff] }
 0x1ba   : > { %3043 = vmatprep.subr.mxu1 %v3339_v2 }
 0x1bb   : > { %3044 = vmatpush3.msra.mxu1 %v1076_v6  ;;  %v2596_v6 = vld [vmem:[%s4170_s5 + $0xf0] sm:$0xff] }
 0x1bc   : > { %3045 = vmatprep.subr.mxu1 %v3339_v2 }
 0x1bd   : > { %3046 = vmatpush3.msra.mxu1 %v1075_v7 }
 0x1be   : > { %3047 = vmatprep.subr.mxu1 %v3339_v2 }
 0x1bf   : > { %3048 = vmatpush3.msra.mxu1 %v1074_v8 }
 0x1c0   : > { %3049 = vmatprep.subr.mxu1 %v3339_v2 }
 0x1c1   : > { %3050 = vmatpush3.msra.mxu1 %v1073_v9 }
 0x1c2   : > { %3051 = vmatprep.subr.mxu1 %v3339_v2 }
 0x1c3   : > { %3052 = vmatpush3.msra.mxu1 %v1072_v10 }
 0x1c4   : > { %3053 = vmatprep.subr.mxu1 %v3339_v2 }
 0x1c5   : > { %3054 = vmatpush3.msra.mxu1 %v1071_v11 }
 0x1c6   : > { %3055 = vmatprep.subr.mxu1 %v3339_v2 }
 0x1c7   : > { %3056 = vmatpush3.msra.mxu1 %v1070_v12 }
 0x1c8   : > { %3057 = vmatprep.subr.mxu1 %v3339_v2 }
 0x1c9   : > { %3058 = vmatpush3.msra.mxu1 %v1069_v13 }
 0x1ca   : > { %3059 = vmatprep.subr.mxu1 %v3339_v2 }
 0x1cb   : > { %3060 = vmatpush3.msra.mxu1 %v1068_v14 }
 0x1cc   : > { %3061 = vmatprep.subr.mxu1 %v3339_v2 }
 0x1cd   : > { %3062 = vmatpush3.msra.mxu1 %v1067_v15  ;;  %v2612_v15 = vld [vmem:[%s4171_s6] ss:$0 sm:$0xff] }
 0x1ce   : > { %3063 = vmatprep.subr.mxu1 %v3339_v2 }
 0x1cf   : > { %3064 = vmatpush3.msra.mxu1 %v1066_v16 }
 0x1d0   : > { %3065 = vmatprep.subr.mxu1 %v3339_v2 }
 0x1d1   : > { %3066 = vmatpush3.msra.mxu1 %v1065_v47  ;;  %v2631_v47 = vld [vmem:[%s4173_s8 + $0x78] sm:$0xff] }
 0x1d2   : > { %3115 = vmatprep.subr.mxu1 %v3339_v2 }
 0x274   : > { %v2989_v20 = vpop.f32.mrf.mxu1 }
 0x275   : > { %v970_v23 = vadd.f32 %v2989_v20, %v790_v19  ;;  %v1494_v20 = vld [vmem:[%s4172_s7] sm:$0x7] }
 0x276   : > { %v960_v24 = vpop.f32.mrf.mxu1 }
 0x277   : > { %v979_v25 = vadd.f32 %v2570_v21, %v970_v23  ;;  %v969_v26 = vadd.f32 %v960_v24, %v785_v22  ;;  %v2624_v23 = vld [vmem:[%s4173_s8 + $0x68] sm:$0xff]  ;;  %v1578_v24 = vld [vmem:[%s4173_s8 + $0x30] sm:$0xff] }
 0x279   : > { %vm981_vm2 = vcmp.ge.f32.partialorder %v979_v25, 0.0  ;;  %v983_v27 = vmul.f32 0.01, %v979_v25  ;;  %v978_v28 = vadd.f32 %v2570_v21, %v969_v26  ;;  %v2615_v21 = vld [vmem:[%s4172_s7 + $0x4] sm:$0x7]  ;;  %v1577_v26 = vld [vmem:[%s4173_s8 + $0x28] sm:$0xff] }
 0x27b   : > { %v982_v29 = vmul.f32 0.01, %v978_v28  ;;  %v3730_v30 = vsel %vm981_vm2, %v979_v25, %v983_v27  ;;  %vm980_vm4 = vcmp.ge.f32.partialorder %v978_v28, 0.0  ;;  %v2623_v25 = vld [vmem:[%s4173_s8 + $0x60] sm:$0xff]  ;;  %v2622_v27 = vld [vmem:[%s4173_s8 + $0x58] sm:$0xff] }
 0x27c   : > { %2991 = vmatpush3.msk.msra.mxu0 %vm991_vm3, %v3730_v30 }
 0x27d   : > { %2992 = vmatprep.subr.mxu0 %v3339_v2  ;;  %v3738_v32 = vsel %vm980_vm4, %v978_v28, %v982_v29  ;;  %v1576_v28 = vld [vmem:[%s4173_s8 + $0x20] sm:$0xff]  ;;  %v2621_v29 = vld [vmem:[%s4173_s8 + $0x50] sm:$0xff] }
 0x27e   : > { %2993 = vmatpush3.msra.mxu0 %v3738_v32 }
 0x27f   : > { %2995 = vmatmul.mubr.msk.f32.vlgmr.msra.gmra.mxu0 %vm987_vm5, %v986_v31  ;;  %2997 = vmatprep.subr.mxu0 %v3339_v2  ;;  %v2620_v31 = vld [vmem:[%s4173_s8 + $0x48] sm:$0xff] }
 0x280   : > { %2998 = vmatpush3.msk.msra.mxu0 %vm991_vm3, %v3730_v30  ;;  %3001 = vmatprep.mubr.msk.f32.mxu0 %vm3340_vm1, %v3339_v2 }
 0x281   : > { %2999 = vmatprep.subr.mxu0 %v3339_v2 }
 0x282   : > { %3000 = vmatpush3.msra.mxu0 %v3738_v32 }
 0x283   : > { %3002 = vmatmul.mubr.msk.f32.vlgmr.msra.gmra.mxu0 %vm987_vm5, %v2573_v33  ;;  %3004 = vmatprep.subr.mxu0 %v3339_v2  ;;  %v2619_v33 = vld [vmem:[%s4173_s8 + $0x40] sm:$0xff] }
 0x284   : > { %3005 = vmatpush3.msra.mxu0 %v2590_v34  ;;  %3034 = vmatprep.mubr.msk.f32.mxu0 %vm3340_vm1, %v3339_v2  ;;  %v1573_v34 = vld [vmem:[%s4173_s8 + $0x8] sm:$0xff] }
 0x285   : > { %3006 = vmatprep.subr.mxu0 %v3339_v2 }
 0x286   : > { %3007 = vmatpush3.msra.mxu0 %v2589_v35  ;;  %v2618_v35 = vld [vmem:[%s4173_s8 + $0x38] sm:$0xff] }
 0x287   : > { %3008 = vmatprep.subr.mxu0 %v3339_v2 }
 0x288   : > { %3009 = vmatpush3.msra.mxu0 %v2588_v36  ;;  %v1572_v36 = vld [vmem:[%s4173_s8] sm:$0xff] }
 0x289   : > { %3010 = vmatprep.subr.mxu0 %v3339_v2 }
 0x28a   : > { %3011 = vmatpush3.msra.mxu0 %v2587_v37 }
 0x28b   : > { %3012 = vmatprep.subr.mxu0 %v3339_v2 }
 0x28c   : > { %3013 = vmatpush3.msra.mxu0 %v2586_v38 }
 0x28d   : > { %3014 = vmatprep.subr.mxu0 %v3339_v2 }
 0x28e   : > { %3015 = vmatpush3.msra.mxu0 %v2585_v39 }
 0x28f   : > { %3016 = vmatprep.subr.mxu0 %v3339_v2 }
 0x290   : > { %3017 = vmatpush3.msra.mxu0 %v2584_v40  ;;  %v2627_v40 = vld [vmem:[%s4172_s7 + $0x8] sm:$0x7] }
 0x291   : > { %3018 = vmatprep.subr.mxu0 %v3339_v2 }
 0x292   : > { %3019 = vmatpush3.msra.mxu0 %v2583_v41 }
 0x293   : > { %3020 = vmatprep.subr.mxu0 %v3339_v2 }
 0x294   : > { %3021 = vmatpush3.msra.mxu0 %v2582_v42  ;;  %v2636_v42 = vld [vmem:[%s4173_s8 + $0xa0] sm:$0xff] }
 0x295   : > { %3022 = vmatprep.subr.mxu0 %v3339_v2 }
 0x296   : > { %3023 = vmatpush3.msra.mxu0 %v2581_v43  ;;  %v2635_v43 = vld [vmem:[%s4173_s8 + $0x98] sm:$0xff] }
 0x297   : > { %3024 = vmatprep.subr.mxu0 %v3339_v2 }
 0x298   : > { %3025 = vmatpush3.msra.mxu0 %v2580_v44  ;;  %v2634_v44 = vld [vmem:[%s4173_s8 + $0x90] sm:$0xff] }
 0x299   : > { %3026 = vmatprep.subr.mxu0 %v3339_v2 }
 0x29a   : > { %3027 = vmatpush3.msra.mxu0 %v2579_v45  ;;  %v2633_v45 = vld [vmem:[%s4173_s8 + $0x88] sm:$0xff] }
 0x29b   : > { %3028 = vmatprep.subr.mxu0 %v3339_v2 }
 0x29c   : > { %3029 = vmatpush3.msra.mxu0 %v2578_v46  ;;  %v2632_v46 = vld [vmem:[%s4173_s8 + $0x80] sm:$0xff] }
 0x29d   : > { %3030 = vmatprep.subr.mxu0 %v3339_v2 }
 0x29e   : > { %3031 = vmatpush3.msra.mxu0 %v2577_v48  ;;  %v2630_v48 = vld [vmem:[%s4173_s8 + $0x70] sm:$0xff] }
 0x29f   : > { %3032 = vmatprep.subr.mxu0 %v3339_v2 }
 0x2a0   : > { %3033 = vmatpush3.msra.mxu0 %v2576_v49 }
 0x2a1   : > { %3070 = vmatprep.subr.mxu0 %v3339_v2 }
 0x33f   : > { %v1061_v50 = vpop.f32.mrf.mxu0 }
 0x340   : > { %3068 = vmatmul.mubr.msk.f32.vlgmr.msra.gmra.mxu1 %vm1171_vm6, %v1061_v50 }
 0x341   : > { %v2996_v51 = vpop.f32.mrf.mxu0  ;;  %3117 = vmatprep.mubr.msk.f32.mxu1 %vm3340_vm1, %v3339_v2 }
 0x343   : > { %v1151_v52 = vpop.f32.mrf.mxu0 }
 0x344   : > { %3035 = vmatmul.mubr.msk.f32.vlgmr.msra.gmra.mxu0 %vm1171_vm6, %v1151_v52 }
 0x345   : > { %3071 = vmatpush3.msk.msra.mxu0 %vm991_vm3, %v3730_v30  ;;  %v3003_v53 = vpop.f32.mrf.mxu0  ;;  %3074 = vmatprep.mubr.msk.f32.mxu0 %vm3340_vm1, %v3339_v2  ;;  %v1575_v30 = vld [vmem:[%s4173_s8 + $0x18] sm:$0xff] }
 0x346   : > { %3072 = vmatprep.subr.mxu0 %v3339_v2 }
 0x347   : > { %3073 = vmatpush3.msra.mxu0 %v3738_v32  ;;  %v1574_v32 = vld [vmem:[%s4173_s8 + $0x10] sm:$0xff] }
 0x348   : > { %3075 = vmatmul.mubr.msk.f32.vlgmr.msra.gmra.mxu0 %vm987_vm5, %v2593_v54  ;;  %3077 = vmatprep.subr.mxu0 %v3339_v2 }
 0x349   : > { %3078 = vmatpush3.msra.mxu0 %v2610_v55  ;;  %3107 = vmatprep.mubr.msk.f32.mxu0 %vm3340_vm1, %v3339_v2 }
 0x34a   : > { %3079 = vmatprep.subr.mxu0 %v3339_v2 }
 0x34b   : > { %3080 = vmatpush3.msra.mxu0 %v2609_v56  ;;  %v2061_v56 = vld [vmem:[%s4176_s11 + $0x28] sm:$0xff] }
 0x34c   : > { %3081 = vmatprep.subr.mxu0 %v3339_v2 }
 0x34d   : > { %3082 = vmatpush3.msra.mxu0 %v2608_v57  ;;  %v2060_v57 = vld [vmem:[%s4176_s11 + $0x20] sm:$0xff] }
 0x34e   : > { %3083 = vmatprep.subr.mxu0 %v3339_v2 }
 0x34f   : > { %3084 = vmatpush3.msra.mxu0 %v2607_v58  ;;  %v2059_v58 = vld [vmem:[%s4176_s11 + $0x18] sm:$0xff] }
 0x350   : > { %3085 = vmatprep.subr.mxu0 %v3339_v2 }
 0x351   : > { %3086 = vmatpush3.msra.mxu0 %v2606_v59  ;;  %v2058_v59 = vld [vmem:[%s4176_s11 + $0x10] sm:$0xff] }
 0x352   : > { %3087 = vmatprep.subr.mxu0 %v3339_v2 }
 0x353   : > { %3088 = vmatpush3.msra.mxu0 %v2605_v60  ;;  %v2057_v60 = vld [vmem:[%s4176_s11 + $0x8] sm:$0xff] }
 0x354   : > { %3089 = vmatprep.subr.mxu0 %v3339_v2 }
 0x355   : > { %3090 = vmatpush3.msra.mxu0 %v2604_v61 }
 0x356   : > { %3091 = vmatprep.subr.mxu0 %v3339_v2 }
 0x357   : > { %3092 = vmatpush3.msra.mxu0 %v2603_v62  ;;  %v2638_v62 = vld [vmem:[%s4174_s9] ss:$0 sm:$0xff] }
 0x358   : > { %3093 = vmatprep.subr.mxu0 %v3339_v2 }
 0x359   : > { %3094 = vmatpush3.msra.mxu0 %v2602_v63 }
 0x35a   : > { %3095 = vmatprep.subr.mxu0 %v3339_v2 }
 0x35b   : > { %3096 = vmatpush3.msra.mxu0 %v2601_v0 }
 0x35c   : > { %3097 = vmatprep.subr.mxu0 %v3339_v2 }
 0x35d   : > { %3098 = vmatpush3.msra.mxu0 %v2600_v1 }
 0x35e   : > { %3099 = vmatprep.subr.mxu0 %v3339_v2 }
 0x35f   : > { %3100 = vmatpush3.msra.mxu0 %v2599_v3 }
 0x360   : > { %3101 = vmatprep.subr.mxu0 %v3339_v2 }
 0x361   : > { %3102 = vmatpush3.msra.mxu0 %v2598_v4  ;;  %v1977_v4 = vld [vmem:[%s4175_s10] sm:$0x1] }
 0x362   : > { %3103 = vmatprep.subr.mxu0 %v3339_v2 }
 0x363   : > { %3104 = vmatpush3.msra.mxu0 %v2597_v5 }
 0x364   : > { %3105 = vmatprep.subr.mxu0 %v3339_v2 }
 0x365   : > { %3106 = vmatpush3.msra.mxu0 %v2596_v6  ;;  %v2641_v6 = vld [vmem:[%s4175_s10 + $0x1] sm:$0x1] }
 0x366   : > { %3110 = vmatprep.subr.mxu0 %v3339_v2 }
 0x400   : > { %v1314_v7 = vpop.f32.mrf.mxu1 }
 0x402   : > { %v3069_v8 = vpop.f32.mrf.mxu1 }
 0x403   : > { %v2648_v8 = vld [vmem:[%s4176_s11 + $0x50] sm:$0xff] }
 0x404   : > { %v1241_v9 = vpop.f32.mrf.mxu0 }
 0x405   : > { %v1315_v10 = vadd.f32 %v1314_v7, %v1241_v9  ;;  %v2649_v7 = vld [vmem:[%s4176_s11 + $0x58] sm:$0xff]  ;;  %v2647_v9 = vld [vmem:[%s4176_s11 + $0x48] sm:$0xff] }
 0x406   : > { %v3036_v11 = vpop.f32.mrf.mxu0 }
 0x407   : > { %v2645_v11 = vld [vmem:[%s4176_s11 + $0x38] sm:$0xff] }
 0x408   : > { %v1389_v12 = vpop.f32.mrf.mxu0 }
 0x409   : > { %3108 = vmatmul.mubr.msk.f32.vlgmr.msra.gmra.mxu0 %vm1171_vm6, %v1389_v12  ;;  %v2056_v12 = vld [vmem:[%s4176_s11] sm:$0xff] }
 0x40a   : > { %v3076_v13 = vpop.f32.mrf.mxu0  ;;  %3112 = vmatprep.mubr.msk.f32.mxu0 %vm3340_vm1, %v3339_v2 }
 0x40b   : > { %v2644_v13 = vld [vmem:[%s4176_s11 + $0x30] sm:$0xff] }
 0x4c9   : > { %v1478_v14 = vpop.f32.mrf.mxu0 }
 0x4ca   : > { %v1482_v16 = vadd.f32 %v1478_v14, %v1315_v10  ;;  %v2646_v10 = vld [vmem:[%s4176_s11 + $0x40] sm:$0xff]  ;;  %v2660_v14 = vld [vmem:[%s4176_s11 + $0x88] sm:$0xff] }
 0x4cb   : > { %v3109_v17 = vpop.f32.mrf.mxu0 }
 0x4cc   : > { %v1490_v18 = vadd.f32 %v2612_v15, %v1482_v16  ;;  %v2659_v16 = vld [vmem:[%s4176_s11 + $0x80] sm:$0xff] }
 0x4ce   : > { %vm1491_vm7 = vcmp.ge.f32.partialorder %v1490_v18, 0.0  ;;  %v1492_v19 = vmul.f32 0.01, %v1490_v18 }
 0x4d0   : > { %v1493_v22 = vsel %vm1491_vm7, %v1490_v18, %v1492_v19 }
 0x4d1   : > { %3111 = vmatpush3.msk.msra.mxu0 %vm991_vm3, %v1493_v22  ;;  %3116 = vmatpush3.msk.msra.mxu1 %vm991_vm3, %v1493_v22 }
 0x4d2   : > { %3113 = vmatmul.mubr.msk.f32.vlgmr.msra.gmra.mxu0 %vm1495_vm8, %v1494_v20  ;;  %3118 = vmatmul.mubr.msk.f32.vlgmr.msra.gmra.mxu1 %vm1495_vm8, %v2615_v21  ;;  %v2652_v20 = vld [vmem:[%s4175_s10 + $0x2] sm:$0x1]  ;;  %v2658_v21 = vld [vmem:[%s4176_s11 + $0x78] sm:$0xff] }
 0x4d3   : > { %3120 = vmatprep.subr.mxu1 %v3339_v2  ;;  %3137 = vmatprep.subr.mxu0 %v3339_v2 }
 0x4d4   : > { %3121 = vmatpush3.msra.mxu1 %v2624_v23  ;;  %3138 = vmatpush3.msra.mxu0 %v1578_v24  ;;  %v2656_v23 = vld [vmem:[%s4176_s11 + $0x68] sm:$0xff]  ;;  %v2655_v24 = vld [vmem:[%s4176_s11 + $0x60] sm:$0xff] }
 0x4d5   : > { %3122 = vmatprep.subr.mxu1 %v3339_v2  ;;  %3139 = vmatprep.subr.mxu0 %v3339_v2 }
 0x4d6   : > { %3123 = vmatpush3.msra.mxu1 %v2623_v25  ;;  %3140 = vmatpush3.msra.mxu0 %v1577_v26 }
 0x4d7   : > { %3124 = vmatprep.subr.mxu1 %v3339_v2  ;;  %3141 = vmatprep.subr.mxu0 %v3339_v2 }
 0x4d8   : > { %3125 = vmatpush3.msra.mxu1 %v2622_v27  ;;  %3142 = vmatpush3.msra.mxu0 %v1576_v28 }
 0x4d9   : > { %3126 = vmatprep.subr.mxu1 %v3339_v2  ;;  %3143 = vmatprep.subr.mxu0 %v3339_v2 }
 0x4da   : > { %3127 = vmatpush3.msra.mxu1 %v2621_v29  ;;  %3144 = vmatpush3.msra.mxu0 %v1575_v30 }
 0x4db   : > { %3128 = vmatprep.subr.mxu1 %v3339_v2  ;;  %3145 = vmatprep.subr.mxu0 %v3339_v2 }
 0x4dc   : > { %3129 = vmatpush3.msra.mxu1 %v2620_v31  ;;  %3146 = vmatpush3.msra.mxu0 %v1574_v32 }
 0x4dd   : > { %3130 = vmatprep.subr.mxu1 %v3339_v2  ;;  %3147 = vmatprep.subr.mxu0 %v3339_v2 }
 0x4de   : > { %3131 = vmatpush3.msra.mxu1 %v2619_v33  ;;  %3148 = vmatpush3.msra.mxu0 %v1573_v34 }
 0x4df   : > { %3132 = vmatprep.subr.mxu1 %v3339_v2  ;;  %3149 = vmatprep.subr.mxu0 %v3339_v2 }
 0x4e0   : > { %3133 = vmatpush3.msra.mxu1 %v2618_v35  ;;  %3134 = vmatprep.mubr.msk.f32.mxu1 %vm3340_vm1, %v3339_v2 }
 0x4e1   : > { %3151 = vmatprep.mubr.msk.f32.mxu0 %vm3340_vm1, %v3339_v2  ;;  %3154 = vmatprep.subr.mxu1 %v3339_v2 }
 0x4e2   : > { %3150 = vmatpush3.msra.mxu0 %v1572_v36 }
 0x4e3   : > { %3176 = vmatprep.subr.mxu0 %v3339_v2 }
 0x592   : > { %v1568_v37 = vpop.f32.mrf.mxu0  ;;  %v1650_v38 = vpop.f32.mrf.mxu1 }
 0x593   : > { %3135 = vmatmul.mubr.msk.f32.vlgmr.msra.gmra.mxu1 %vm1662_vm9, %v1650_v38  ;;  %3152 = vmatmul.mubr.msk.f32.vlgmr.msra.gmra.mxu0 %vm1662_vm9, %v1568_v37 }
 0x594   : > { %3155 = vmatpush3.msk.msra.mxu1 %vm991_vm3, %v1493_v22  ;;  %v3119_v39 = vpop.f32.mrf.mxu1  ;;  %3156 = vmatprep.mubr.msk.f32.mxu1 %vm3340_vm1, %v3339_v2  ;;  %v3114_v41 = vpop.f32.mrf.mxu0  ;;  %v2657_v22 = vld [vmem:[%s4176_s11 + $0x70] sm:$0xff] }
 0x595   : > { %3159 = vmatprep.subr.mxu1 %v3339_v2  ;;  %3178 = vmatprep.mubr.msk.f32.mxu0 %vm3340_vm1, %v3339_v2 }
 0x597   : > { %3157 = vmatmul.mubr.msk.f32.vlgmr.msra.gmra.mxu1 %vm1495_vm8, %v2627_v40 }
 0x598   : > { %3160 = vmatpush3.msra.mxu1 %v2636_v42  ;;  %3173 = vmatprep.mubr.msk.f32.mxu1 %vm3340_vm1, %v3339_v2 }
 0x599   : > { %3161 = vmatprep.subr.mxu1 %v3339_v2 }
 0x59a   : > { %3162 = vmatpush3.msra.mxu1 %v2635_v43 }
 0x59b   : > { %3163 = vmatprep.subr.mxu1 %v3339_v2 }
 0x59c   : > { %3164 = vmatpush3.msra.mxu1 %v2634_v44 }
 0x59d   : > { %3165 = vmatprep.subr.mxu1 %v3339_v2 }
 0x59e   : > { %3166 = vmatpush3.msra.mxu1 %v2633_v45 }
 0x59f   : > { %3167 = vmatprep.subr.mxu1 %v3339_v2 }
 0x5a0   : > { %3168 = vmatpush3.msra.mxu1 %v2632_v46 }
 0x5a1   : > { %3169 = vmatprep.subr.mxu1 %v3339_v2 }
 0x5a2   : > { %3170 = vmatpush3.msra.mxu1 %v2631_v47 }
 0x5a3   : > { %3171 = vmatprep.subr.mxu1 %v3339_v2 }
 0x5a4   : > { %3172 = vmatpush3.msra.mxu1 %v2630_v48 }
 0x5a5   : > { %3201 = vmatprep.subr.mxu1 %v3339_v2 }
 0x653   : > { %v1732_v49 = vpop.f32.mrf.mxu1  ;;  %v1805_v50 = vpop.f32.mrf.mxu0 }
 0x654   : > { %v1806_v51 = vadd.f32 %v1805_v50, %v1732_v49 }
 0x655   : > { %v3136_v52 = vpop.f32.mrf.mxu1  ;;  %v3153_v53 = vpop.f32.mrf.mxu0 }
 0x657   : > { %v1880_v54 = vpop.f32.mrf.mxu1 }
 0x658   : > { %3174 = vmatmul.mubr.msk.f32.vlgmr.msra.gmra.mxu1 %vm1662_vm9, %v1880_v54 }
 0x659   : > { %v3158_v55 = vpop.f32.mrf.mxu1  ;;  %3213 = vmatprep.mubr.msk.f32.mxu1 %vm3340_vm1, %v3339_v2  ;;  %3202 = vmatpush3.msra.mxu1 %v2061_v56 }
 0x65a   : > { %3203 = vmatprep.subr.mxu1 %v3339_v2 }
 0x65b   : > { %3204 = vmatpush3.msra.mxu1 %v2060_v57 }
 0x65c   : > { %3205 = vmatprep.subr.mxu1 %v3339_v2 }
 0x65d   : > { %3206 = vmatpush3.msra.mxu1 %v2059_v58 }
 0x65e   : > { %3207 = vmatprep.subr.mxu1 %v3339_v2 }
 0x65f   : > { %3208 = vmatpush3.msra.mxu1 %v2058_v59 }
 0x660   : > { %3209 = vmatprep.subr.mxu1 %v3339_v2 }
 0x661   : > { %3210 = vmatpush3.msra.mxu1 %v2057_v60 }
 0x662   : > { %3211 = vmatprep.subr.mxu1 %v3339_v2 }
 0x663   : > { %3212 = vmatpush3.msra.mxu1 %v2056_v12 }
 0x664   : > { %3221 = vmatprep.subr.mxu1 %v3339_v2 }
 0x718   : > { %v1961_v61 = vpop.f32.mrf.mxu1 }
 0x719   : > { %v1965_v63 = vadd.f32 %v1961_v61, %v1806_v51 }
 0x71a   : > { %v3175_v0 = vpop.f32.mrf.mxu1 }
 0x71b   : > { %v1973_v1 = vadd.f32 %v2638_v62, %v1965_v63 }
 0x71d   : > { %vm1974_vm10 = vcmp.ge.f32.partialorder %v1973_v1, 0.0  ;;  %v1975_v3 = vmul.f32 0.01, %v1973_v1 }
 0x71f   : > { %v1976_v5 = vsel %vm1974_vm10, %v1973_v1, %v1975_v3 }
 0x720   : > { %3177 = vmatpush3.msk.msra.mxu0 %vm1982_vm11, %v1976_v5 }
 0x721   : > { %3179 = vmatmul.mubr.msk.f32.vlgmr.msra.gmra.mxu0 %vm1978_vm12, %v1977_v4  ;;  %3181 = vmatprep.subr.mxu0 %v3339_v2 }
 0x722   : > { %3182 = vmatpush3.msk.msra.mxu0 %vm1982_vm11, %v1976_v5  ;;  %3183 = vmatprep.mubr.msk.f32.mxu0 %vm3340_vm1, %v3339_v2 }
 0x723   : > { %3186 = vmatprep.subr.mxu0 %v3339_v2 }
 0x725   : > { %3184 = vmatmul.mubr.msk.f32.vlgmr.msra.gmra.mxu0 %vm1978_vm12, %v2641_v6 }
 0x726   : > { %3187 = vmatpush3.msra.mxu0 %v2649_v7  ;;  %3198 = vmatprep.mubr.msk.f32.mxu0 %vm3340_vm1, %v3339_v2 }
 0x727   : > { %3188 = vmatprep.subr.mxu0 %v3339_v2 }
 0x728   : > { %3189 = vmatpush3.msra.mxu0 %v2648_v8 }
 0x729   : > { %3190 = vmatprep.subr.mxu0 %v3339_v2 }
 0x72a   : > { %3191 = vmatpush3.msra.mxu0 %v2647_v9 }
 0x72b   : > { %3192 = vmatprep.subr.mxu0 %v3339_v2 }
 0x72c   : > { %3193 = vmatpush3.msra.mxu0 %v2646_v10 }
 0x72d   : > { %3194 = vmatprep.subr.mxu0 %v3339_v2 }
 0x72e   : > { %3195 = vmatpush3.msra.mxu0 %v2645_v11 }
 0x72f   : > { %3196 = vmatprep.subr.mxu0 %v3339_v2 }
 0x730   : > { %3197 = vmatpush3.msra.mxu0 %v2644_v13 }
 0x731   : > { %3216 = vmatprep.subr.mxu0 %v3339_v2 }
 0x7e1   : > { %v2052_v15 = vpop.f32.mrf.mxu0 }
 0x7e2   : > { %3214 = vmatmul.mubr.msk.f32.vlgmr.msra.gmra.mxu1 %vm2144_vm13, %v2052_v15 }
 0x7e3   : > { %v3180_v17 = vpop.f32.mrf.mxu0  ;;  %3222 = vmatpush3.msra.mxu1 %v2660_v14  ;;  %3233 = vmatprep.mubr.msk.f32.mxu1 %vm3340_vm1, %v3339_v2 }
 0x7e4   : > { %3223 = vmatprep.subr.mxu1 %v3339_v2 }
 0x7e5   : > { %v2133_v18 = vpop.f32.mrf.mxu0  ;;  %3224 = vmatpush3.msra.mxu1 %v2659_v16 }
 0x7e6   : > { %3199 = vmatmul.mubr.msk.f32.vlgmr.msra.gmra.mxu0 %vm2144_vm13, %v2133_v18  ;;  %3225 = vmatprep.subr.mxu1 %v3339_v2 }
 0x7e7   : > { %3217 = vmatpush3.msk.msra.mxu0 %vm1982_vm11, %v1976_v5  ;;  %v3185_v19 = vpop.f32.mrf.mxu0  ;;  %3218 = vmatprep.mubr.msk.f32.mxu0 %vm3340_vm1, %v3339_v2 }
 0x7e8   : > { %3226 = vmatpush3.msra.mxu1 %v2658_v21 }
 0x7e9   : > { %3227 = vmatprep.subr.mxu1 %v3339_v2 }
 0x7ea   : > { %3219 = vmatmul.mubr.msk.f32.vlgmr.msra.gmra.mxu0 %vm1978_vm12, %v2652_v20  ;;  %3228 = vmatpush3.msra.mxu1 %v2657_v22 }
 0x7eb   : > { %3229 = vmatprep.subr.mxu1 %v3339_v2 }
 0x7ec   : > { %3230 = vmatpush3.msra.mxu1 %v2656_v23 }
 0x7ed   : > { %3231 = vmatprep.subr.mxu1 %v3339_v2  ;;  %v2447_v2 = vld [vmem:[%s4177_s12] sm:$0x1] }
 0x7ee   : > { %3232 = vmatpush3.msra.mxu1 %v2655_v24 }
 0x8a2   : > { %v2287_v25 = vpop.f32.mrf.mxu1 }
 0x8a4   : > { %v3215_v26 = vpop.f32.mrf.mxu1 }
 0x8a6   : > { %v2214_v27 = vpop.f32.mrf.mxu0 }
 0x8a7   : > { %v2288_v28 = vadd.f32 %v2287_v25, %v2214_v27 }
 0x8a8   : > { %v3200_v29 = vpop.f32.mrf.mxu0 }
 0x8aa   : > { %v2362_v30 = vpop.f32.mrf.mxu0 }
 0x8ab   : > { %3234 = vmatmul.mubr.msk.f32.vlgmr.msra.gmra.mxu1 %vm2144_vm13, %v2362_v30 }
 0x8ac   : > { %v3220_v31 = vpop.f32.mrf.mxu0 }
 0x96b   : > { %v2442_v32 = vpop.f32.mrf.mxu1 }
 0x96c   : > { %v2446_v33 = vadd.f32 %v2442_v32, %v2288_v28 }
 0x96d   : > { %v3235_v34 = vpop.f32.mrf.mxu1 }
 0x96e   : > { %v2448_v35 = vadd.f32 %v2447_v2, %v2446_v33 }
 0x970   : > { %vm2449_vm14 = vcmp.ge.f32.partialorder %v2448_v35, 0.0  ;;  %v2450_v36 = vmul.f32 0.01, %v2448_v35 }
 0x972   : > { %v2451_v37 = vsel %vm2449_vm14, %v2448_v35, %v2450_v36 }
 0x973   : > { %2453 = vst.msk [vmem:[%s432_s23] sm:$0x1] %vm2452_vm15, %v2451_v37 }
 0x974   : > { %3290 = shalt.err (!%p3287_p3)
}
 0x975   : > { %s3291_s22 = scalar_lea.hbm %s4130_s15, 16  ;;  %s3295_s24 = scalar_lea.hbm %s4178_s13, 32 }
 0x976   : > { %p3292_p4 = scmp.ne.s32.totalorder %s4130_s15, %s3291_s22  ;;  %p3296_p9 = scmp.lt.s32.totalorder %s4130_s15, %s4178_s13 }
 0x977   : > { %p3297_p10 = scmp.lt.s32.totalorder %s3295_s24, %s3291_s22 }
 0x978   : > { %p3293_p7 = pnand %p3292_p4, %p3450_p5 }
 0x979   : > { %p3298_p11 = por %p3297_p10, %p3296_p9 }
 0x97a   : > { %p3294_p8 = pneg %p3293_p7 }
 0x97c   : > { %p3299_p12 = pnand %p3298_p11, %p3294_p8 }
 0x97e   : > { %3302 = shalt.err (!%p3299_p12)
}
 0x97f   : > { %3236 = dma.vmem_to_hbm [thread:$0]  (%p3450_p5), %s2468_s17, 16, %s4130_s15, %s2455_s20  }
 0x980 PF: > { %p3242_p13 = scmp.ge.s32.totalorder %s3337_s28, 2  ;;  %s2479_s0 = sand.u32 1, %s3325_s25  }
 0x981   : > { %s2480_s1 = scalar_lea.sflag [#allocation3], %s2479_s0 }
 0x982   : > { %p3239_p0 = pnand %p3242_p13, %p3454_p6 }
 0x984   : > { %p3240_p1 = pneg %p3239_p0 }
 0x986   : > { %3320 = dma.done.wait (%p3240_p1), %s2480_s1, 16  }
 0x987   : > { %3322 = vsyncadd (%p3240_p1), %s2480_s1, 4294967280  ;;  %s4186_s21 = sld [smem:[#allocation5_spill]]  ;;  %p23_p2 = scmp.ge.s32.totalorder %s3437_s14, 4  }
 0x988   : > { %s4187_s25 = smov %s3329_s26  ;;  %s4188_s26 = smov %s3333_s27 }
 0x989   : > { %s4190_s28 = smov %s3437_s14  ;;  %25 = sbr.rel (!%p23_p2) target bundleno = 6 (0x6), region = 123 }
 0x98d   : > { %s4189_s27 = smov %s4186_s21 }
 0x98e   :  { %2484 = vsyncpa [#allocation3], 1 }
 0x98f   :  { %2486 = vsyncpa [#allocation3 + $0x1], 1 }

</bundles_post_ra>
